<compile_context>
chip_gen: v5e
topology: v5e:2x2
jax: 0.10.0
libtpu: 0.0.40
codegen_flags: <defaults>
</compile_context>

<pallas_src>
import functools

import numpy as np

import jax
import jax.numpy as jnp
from jax import lax
from jax.experimental import pallas as pl
from jax.experimental.pallas import tpu as pltpu


def _lstm_kernel(x_ref, wih_ref, b_ref, whh_ref, wout_ref, bout_ref, out_ref, *,
                 hp, seq_len):
    """Full T-step recurrence + final Linear in one kernel invocation."""
    h = jnp.zeros((1, hp), jnp.float32)
    c = jnp.zeros((1, hp), jnp.float32)

    mxu_dtype = whh_ref.dtype

    # T is tiny and static: full unroll for cross-step scheduling visibility.
    for t in range(seq_len):
        # Input contribution + bias: scalar (SMEM) * row + row.  Depends only on x and
        # constants -> off the h->h critical path, hidden under the previous step's matmul.
        gxb = x_ref[t] * wih_ref[...] + b_ref[...]                      # (1, 4*HP)

        # Recurrent matmul: RHS streamed from VMEM each step (no 32/64-vreg live value).
        gates = gxb + jnp.dot(h.astype(mxu_dtype), whh_ref[...],
                              preferred_element_type=jnp.float32)       # (1, 4*HP)

        # 0.5 pre-scale for the sigmoid gates is already folded into the weights, so a
        # single wide EUP tanh covers all four gates.
        th = jnp.tanh(gates)
        i_g = 0.5 * th[:, 0 * hp:1 * hp] + 0.5     # sigmoid(pre_i)
        f_g = 0.5 * th[:, 1 * hp:2 * hp] + 0.5     # sigmoid(pre_f)
        g_g = th[:, 2 * hp:3 * hp]                 # tanh(pre_g)
        o_g = 0.5 * th[:, 3 * hp:4 * hp] + 0.5     # sigmoid(pre_o)

        c = f_g * c + i_g * g_g
        h = o_g * jnp.tanh(c)

    # predictions[-1] = Linear(h_T): output_size == 1, so elementwise mul + lane reduce
    # (XLU slot, otherwise idle) instead of a 127/128-dead-column MXU matmul.
    res = jnp.sum(h * wout_ref[...], axis=-1, keepdims=True)            # (1, 1)
    out_ref[...] = res + bout_ref[...]                                  # lane 0 is the answer


def _round_up(n, m):
    return ((n + m - 1) // m) * m


def prepare_lstm_params(params, hidden_size, input_size=1, output_size=1, mxu_bf16=True):
    """One-time re-layout of PyTorch-style (w_ih, w_hh, b_ih, b_hh, w_lin, b_lin).

    Hoisted off the per-call path: call once at parameter-load time, reuse the result
    for every forward().  mxu_bf16=True (default on all generations) casts the recurrent
    weight to bf16 for the MXU; accumulation and gate math stay f32.
    """
    assert input_size == 1, "kernel is specialized for the module's input_size=1"
    assert output_size == 1, "kernel is specialized for the module's output_size=1"
    w_ih, w_hh, b_ih, b_hh, w_lin, b_lin = [np.asarray(p, dtype=np.float32) for p in params]

    H, O = hidden_size, output_size
    HP = _round_up(H, 128)
    OPAD = 128  # lane-padded output row

    wih_row = np.zeros((1, 4 * HP), np.float32)
    whh_pad = np.zeros((HP, 4 * HP), np.float32)
    b_pad = np.zeros((1, 4 * HP), np.float32)

    # Gate order i, f, g, o.  Fold sigmoid(x) = 0.5*tanh(0.5*x)+0.5's 0.5 pre-scale into
    # the i/f/o gate columns so the kernel's single tanh covers all gates.
    gate_scale = (0.5, 0.5, 1.0, 0.5)
    for k, s in enumerate(gate_scale):
        wih_row[0, k * HP:k * HP + H] = s * w_ih[k * H:(k + 1) * H, 0]
        whh_pad[:H, k * HP:k * HP + H] = s * w_hh[k * H:(k + 1) * H, :].T
        b_pad[0, k * HP:k * HP + H] = s * (b_ih[k * H:(k + 1) * H] + b_hh[k * H:(k + 1) * H])

    wout_row = np.zeros((1, HP), np.float32)
    wout_row[0, :H] = w_lin[0, :]
    bout_pad = np.zeros((1, OPAD), np.float32)
    bout_pad[0, :O] = b_lin

    whh_dtype = jnp.bfloat16 if mxu_bf16 else jnp.float32
    return dict(
        hp=HP, opad=OPAD, output_size=O,
        wih=jnp.asarray(wih_row),
        b=jnp.asarray(b_pad),
        whh=jnp.asarray(whh_pad).astype(whh_dtype),
        wout=jnp.asarray(wout_row),
        bout=jnp.asarray(bout_pad),
    )


def lstm_forward_pallas(input_seq, prep):
    """Equivalent of LSTM.forward(input_seq) with zero initial hidden/cell state."""
    T = int(input_seq.shape[0])
    hp = prep["hp"]

    x = input_seq.reshape(T).astype(jnp.float32)

    # Single-sequence recurrence: whole arrays resident in VMEM/SMEM, no grid / pipelining.
    # TODO(synk): for batched inference, add a leading batch grid axis (B rows of h per
    # step) with dimension_semantics=("parallel",) and constant index_maps on the weights
    # so both v7x TensorCores are used and the weight DMA is amortized.
    out = pl.pallas_call(
        functools.partial(_lstm_kernel, hp=hp, seq_len=T),
        out_shape=jax.ShapeDtypeStruct((1, prep["opad"]), jnp.float32),
        in_specs=[
            pl.BlockSpec(memory_space=pltpu.MemorySpace.SMEM),   # x (scalars)
            pl.BlockSpec(memory_space=pltpu.MemorySpace.VMEM),   # W_ih row
            pl.BlockSpec(memory_space=pltpu.MemorySpace.VMEM),   # bias
            pl.BlockSpec(memory_space=pltpu.MemorySpace.VMEM),   # W_hh
            pl.BlockSpec(memory_space=pltpu.MemorySpace.VMEM),   # W_out row
            pl.BlockSpec(memory_space=pltpu.MemorySpace.VMEM),   # b_out
        ],
        out_specs=pl.BlockSpec(memory_space=pltpu.MemorySpace.VMEM),
    )(x, prep["wih"], prep["b"], prep["whh"], prep["wout"], prep["bout"])

    return out[0, :prep["output_size"]]   # shape (output_size,) == predictions[-1]


def lstm_forward_ref(input_seq, params, hidden_size, input_size=1, output_size=1):
    """Pure-JAX reference (same math as torch nn.LSTM + nn.Linear, zero initial state)."""
    w_ih, w_hh, b_ih, b_hh, w_lin, b_lin = params
    T = input_seq.shape[0]
    H = hidden_size
    x = input_seq.reshape(T, input_size).astype(jnp.float32)

    def step(carry, x_t):
        h, c = carry
        gates = x_t @ w_ih.T + h @ w_hh.T + b_ih + b_hh
        i = jax.nn.sigmoid(gates[0 * H:1 * H])
        f = jax.nn.sigmoid(gates[1 * H:2 * H])
        g = jnp.tanh(gates[2 * H:3 * H])
        o = jax.nn.sigmoid(gates[3 * H:4 * H])
        c = f * c + i * g
        h = o * jnp.tanh(c)
        return (h, c), h

    (h, _), _ = lax.scan(step, (jnp.zeros(H), jnp.zeros(H)), x)
    return h @ w_lin.T + b_lin


if __name__ == "__main__":
    INPUT_SIZE = 1
    HIDDEN = 100      # module default hidden_layer_size
    OUTPUT_SIZE = 1
    T = 8             # sequence length

    key = jax.random.PRNGKey(0)
    ks = jax.random.split(key, 7)
    bound = float(1.0 / np.sqrt(HIDDEN))

    # Deterministic synthetic parameters (uniform in [-1/sqrt(H), 1/sqrt(H)], like PyTorch init).
    w_ih = jax.random.uniform(ks[0], (4 * HIDDEN, INPUT_SIZE), jnp.float32, -bound, bound)
    w_hh = jax.random.uniform(ks[1], (4 * HIDDEN, HIDDEN), jnp.float32, -bound, bound)
    b_ih = jax.random.uniform(ks[2], (4 * HIDDEN,), jnp.float32, -bound, bound)
    b_hh = jax.random.uniform(ks[3], (4 * HIDDEN,), jnp.float32, -bound, bound)
    w_lin = jax.random.uniform(ks[4], (OUTPUT_SIZE, HIDDEN), jnp.float32, -bound, bound)
    b_lin = jax.random.uniform(ks[5], (OUTPUT_SIZE,), jnp.float32, -bound, bound)
    params = (w_ih, w_hh, b_ih, b_hh, w_lin, b_lin)

    # input_seq: 1-D sequence of length T (input_size = 1), as the PyTorch forward implies.
    input_seq = jax.random.normal(ks[6], (T,), jnp.float32)

    ref = lstm_forward_ref(input_seq, params, HIDDEN, INPUT_SIZE, OUTPUT_SIZE)

    # One-time parameter re-layout (default: bf16 MXU operands on all generations).
    prep = prepare_lstm_params(params, HIDDEN, INPUT_SIZE, OUTPUT_SIZE)
    forward = jax.jit(lambda s: lstm_forward_pallas(s, prep))

    pred = jax.block_until_ready(forward(input_seq))
    assert pred.shape == (OUTPUT_SIZE,), pred.shape
    # TODO(synk): bf16 W_hh rounding feeds back through h/c each step; revalidate tolerance
    # before using the bf16 default for much longer sequences.
    assert jnp.allclose(pred, ref, rtol=5e-2, atol=5e-2), (pred, ref)

    # Full-f32 MXU path: exact match with the reference.
    prep_f32 = prepare_lstm_params(params, HIDDEN, INPUT_SIZE, OUTPUT_SIZE, mxu_bf16=False)
    pred_f32 = jax.block_until_ready(lstm_forward_pallas(input_seq, prep_f32))
    assert jnp.allclose(pred_f32, ref, rtol=1e-5, atol=1e-5), (pred_f32, ref)

    # TODO(synk): persistent self.hidden_cell mutation across forward() calls is module
    # state, not kernel math; this kernel starts each call from the zero hidden/cell state.
    print("KERNEL_OK")
</pallas_src>

<mosaic_0001>
module attributes {stable_mosaic.version = 11 : i64} {
  func.func @_lstm_kernel(%arg0: memref<8xf32, #tpu.memory_space<smem>>, %arg1: memref<1x512xf32, #tpu.memory_space<vmem>>, %arg2: memref<1x512xf32, #tpu.memory_space<vmem>>, %arg3: memref<128x512xbf16, #tpu.memory_space<vmem>>, %arg4: memref<1x128xf32, #tpu.memory_space<vmem>>, %arg5: memref<1x128xf32, #tpu.memory_space<vmem>>, %arg6: memref<1x128xf32, #tpu.memory_space<vmem>>) attributes {dimension_semantics = [], scalar_prefetch = 0 : i64, scratch_operands = 0 : i64, tpu.core_type = #tpu.core_type<tc>} {
    %cst = arith.constant 0.000000e+00 : f32
    %0 = vector.broadcast %cst : f32 to vector<1x128xf32>
    %cst_0 = arith.constant 0.000000e+00 : f32
    %1 = vector.broadcast %cst_0 : f32 to vector<1x128xf32>
    %c0 = arith.constant 0 : index
    %2 = memref.load %arg0[%c0] : memref<8xf32, #tpu.memory_space<smem>>
    %c0_1 = arith.constant 0 : index
    %c0_2 = arith.constant 0 : index
    %3 = vector.load %arg1[%c0_1, %c0_2] : memref<1x512xf32, #tpu.memory_space<vmem>>, vector<1x512xf32>
    %4 = vector.broadcast %2 : f32 to vector<1x512xf32>
    %5 = arith.mulf %4, %3 : vector<1x512xf32>
    %c0_3 = arith.constant 0 : index
    %c0_4 = arith.constant 0 : index
    %6 = vector.load %arg2[%c0_3, %c0_4] : memref<1x512xf32, #tpu.memory_space<vmem>>, vector<1x512xf32>
    %7 = arith.addf %5, %6 : vector<1x512xf32>
    %8 = arith.truncf %0 : vector<1x128xf32> to vector<1x128xbf16>
    %c0_5 = arith.constant 0 : index
    %c0_6 = arith.constant 0 : index
    %9 = vector.load %arg3[%c0_5, %c0_6] : memref<128x512xbf16, #tpu.memory_space<vmem>>, vector<128x512xbf16>
    %cst_7 = arith.constant dense<0.000000e+00> : vector<1x512xf32>
    %10 = tpu.matmul %8, %9, %cst_7 {dimension_numbers = #tpu.dot_dimension_numbers<[1], [0], [0], [1], [0, 0, 1, 1], [], []>} : vector<1x128xbf16>, vector<128x512xbf16>, vector<1x512xf32> -> vector<1x512xf32>
    %11 = arith.addf %7, %10 : vector<1x512xf32>
    %12 = math.tanh %11 : vector<1x512xf32>
    %13 = vector.extract_strided_slice %12 {offsets = [0, 0], sizes = [1, 128], strides = [1, 1]} : vector<1x512xf32> to vector<1x128xf32>
    %cst_8 = arith.constant 5.000000e-01 : f32
    %14 = vector.broadcast %cst_8 : f32 to vector<1x128xf32>
    %15 = arith.mulf %14, %13 : vector<1x128xf32>
    %cst_9 = arith.constant 5.000000e-01 : f32
    %16 = vector.broadcast %cst_9 : f32 to vector<1x128xf32>
    %17 = arith.addf %15, %16 : vector<1x128xf32>
    %18 = vector.extract_strided_slice %12 {offsets = [0, 128], sizes = [1, 128], strides = [1, 1]} : vector<1x512xf32> to vector<1x128xf32>
    %cst_10 = arith.constant 5.000000e-01 : f32
    %19 = vector.broadcast %cst_10 : f32 to vector<1x128xf32>
    %20 = arith.mulf %19, %18 : vector<1x128xf32>
    %cst_11 = arith.constant 5.000000e-01 : f32
    %21 = vector.broadcast %cst_11 : f32 to vector<1x128xf32>
    %22 = arith.addf %20, %21 : vector<1x128xf32>
    %23 = vector.extract_strided_slice %12 {offsets = [0, 256], sizes = [1, 128], strides = [1, 1]} : vector<1x512xf32> to vector<1x128xf32>
    %24 = vector.extract_strided_slice %12 {offsets = [0, 384], sizes = [1, 128], strides = [1, 1]} : vector<1x512xf32> to vector<1x128xf32>
    %cst_12 = arith.constant 5.000000e-01 : f32
    %25 = vector.broadcast %cst_12 : f32 to vector<1x128xf32>
    %26 = arith.mulf %25, %24 : vector<1x128xf32>
    %cst_13 = arith.constant 5.000000e-01 : f32
    %27 = vector.broadcast %cst_13 : f32 to vector<1x128xf32>
    %28 = arith.addf %26, %27 : vector<1x128xf32>
    %29 = arith.mulf %22, %1 : vector<1x128xf32>
    %30 = arith.mulf %17, %23 : vector<1x128xf32>
    %31 = arith.addf %29, %30 : vector<1x128xf32>
    %32 = math.tanh %31 : vector<1x128xf32>
    %33 = arith.mulf %28, %32 : vector<1x128xf32>
    %c1 = arith.constant 1 : index
    %34 = memref.load %arg0[%c1] : memref<8xf32, #tpu.memory_space<smem>>
    %c0_14 = arith.constant 0 : index
    %c0_15 = arith.constant 0 : index
    %35 = vector.load %arg1[%c0_14, %c0_15] : memref<1x512xf32, #tpu.memory_space<vmem>>, vector<1x512xf32>
    %36 = vector.broadcast %34 : f32 to vector<1x512xf32>
    %37 = arith.mulf %36, %35 : vector<1x512xf32>
    %c0_16 = arith.constant 0 : index
    %c0_17 = arith.constant 0 : index
    %38 = vector.load %arg2[%c0_16, %c0_17] : memref<1x512xf32, #tpu.memory_space<vmem>>, vector<1x512xf32>
    %39 = arith.addf %37, %38 : vector<1x512xf32>
    %40 = arith.truncf %33 : vector<1x128xf32> to vector<1x128xbf16>
    %c0_18 = arith.constant 0 : index
    %c0_19 = arith.constant 0 : index
    %41 = vector.load %arg3[%c0_18, %c0_19] : memref<128x512xbf16, #tpu.memory_space<vmem>>, vector<128x512xbf16>
    %cst_20 = arith.constant dense<0.000000e+00> : vector<1x512xf32>
    %42 = tpu.matmul %40, %41, %cst_20 {dimension_numbers = #tpu.dot_dimension_numbers<[1], [0], [0], [1], [0, 0, 1, 1], [], []>} : vector<1x128xbf16>, vector<128x512xbf16>, vector<1x512xf32> -> vector<1x512xf32>
    %43 = arith.addf %39, %42 : vector<1x512xf32>
    %44 = math.tanh %43 : vector<1x512xf32>
    %45 = vector.extract_strided_slice %44 {offsets = [0, 0], sizes = [1, 128], strides = [1, 1]} : vector<1x512xf32> to vector<1x128xf32>
    %cst_21 = arith.constant 5.000000e-01 : f32
    %46 = vector.broadcast %cst_21 : f32 to vector<1x128xf32>
    %47 = arith.mulf %46, %45 : vector<1x128xf32>
    %cst_22 = arith.constant 5.000000e-01 : f32
    %48 = vector.broadcast %cst_22 : f32 to vector<1x128xf32>
    %49 = arith.addf %47, %48 : vector<1x128xf32>
    %50 = vector.extract_strided_slice %44 {offsets = [0, 128], sizes = [1, 128], strides = [1, 1]} : vector<1x512xf32> to vector<1x128xf32>
    %cst_23 = arith.constant 5.000000e-01 : f32
    %51 = vector.broadcast %cst_23 : f32 to vector<1x128xf32>
    %52 = arith.mulf %51, %50 : vector<1x128xf32>
    %cst_24 = arith.constant 5.000000e-01 : f32
    %53 = vector.broadcast %cst_24 : f32 to vector<1x128xf32>
    %54 = arith.addf %52, %53 : vector<1x128xf32>
    %55 = vector.extract_strided_slice %44 {offsets = [0, 256], sizes = [1, 128], strides = [1, 1]} : vector<1x512xf32> to vector<1x128xf32>
    %56 = vector.extract_strided_slice %44 {offsets = [0, 384], sizes = [1, 128], strides = [1, 1]} : vector<1x512xf32> to vector<1x128xf32>
    %cst_25 = arith.constant 5.000000e-01 : f32
    %57 = vector.broadcast %cst_25 : f32 to vector<1x128xf32>
    %58 = arith.mulf %57, %56 : vector<1x128xf32>
    %cst_26 = arith.constant 5.000000e-01 : f32
    %59 = vector.broadcast %cst_26 : f32 to vector<1x128xf32>
    %60 = arith.addf %58, %59 : vector<1x128xf32>
    %61 = arith.mulf %54, %31 : vector<1x128xf32>
    %62 = arith.mulf %49, %55 : vector<1x128xf32>
    %63 = arith.addf %61, %62 : vector<1x128xf32>
    %64 = math.tanh %63 : vector<1x128xf32>
    %65 = arith.mulf %60, %64 : vector<1x128xf32>
    %c2 = arith.constant 2 : index
    %66 = memref.load %arg0[%c2] : memref<8xf32, #tpu.memory_space<smem>>
    %c0_27 = arith.constant 0 : index
    %c0_28 = arith.constant 0 : index
    %67 = vector.load %arg1[%c0_27, %c0_28] : memref<1x512xf32, #tpu.memory_space<vmem>>, vector<1x512xf32>
    %68 = vector.broadcast %66 : f32 to vector<1x512xf32>
    %69 = arith.mulf %68, %67 : vector<1x512xf32>
    %c0_29 = arith.constant 0 : index
    %c0_30 = arith.constant 0 : index
    %70 = vector.load %arg2[%c0_29, %c0_30] : memref<1x512xf32, #tpu.memory_space<vmem>>, vector<1x512xf32>
    %71 = arith.addf %69, %70 : vector<1x512xf32>
    %72 = arith.truncf %65 : vector<1x128xf32> to vector<1x128xbf16>
    %c0_31 = arith.constant 0 : index
    %c0_32 = arith.constant 0 : index
    %73 = vector.load %arg3[%c0_31, %c0_32] : memref<128x512xbf16, #tpu.memory_space<vmem>>, vector<128x512xbf16>
    %cst_33 = arith.constant dense<0.000000e+00> : vector<1x512xf32>
    %74 = tpu.matmul %72, %73, %cst_33 {dimension_numbers = #tpu.dot_dimension_numbers<[1], [0], [0], [1], [0, 0, 1, 1], [], []>} : vector<1x128xbf16>, vector<128x512xbf16>, vector<1x512xf32> -> vector<1x512xf32>
    %75 = arith.addf %71, %74 : vector<1x512xf32>
    %76 = math.tanh %75 : vector<1x512xf32>
    %77 = vector.extract_strided_slice %76 {offsets = [0, 0], sizes = [1, 128], strides = [1, 1]} : vector<1x512xf32> to vector<1x128xf32>
    %cst_34 = arith.constant 5.000000e-01 : f32
    %78 = vector.broadcast %cst_34 : f32 to vector<1x128xf32>
    %79 = arith.mulf %78, %77 : vector<1x128xf32>
    %cst_35 = arith.constant 5.000000e-01 : f32
    %80 = vector.broadcast %cst_35 : f32 to vector<1x128xf32>
    %81 = arith.addf %79, %80 : vector<1x128xf32>
    %82 = vector.extract_strided_slice %76 {offsets = [0, 128], sizes = [1, 128], strides = [1, 1]} : vector<1x512xf32> to vector<1x128xf32>
    %cst_36 = arith.constant 5.000000e-01 : f32
    %83 = vector.broadcast %cst_36 : f32 to vector<1x128xf32>
    %84 = arith.mulf %83, %82 : vector<1x128xf32>
    %cst_37 = arith.constant 5.000000e-01 : f32
    %85 = vector.broadcast %cst_37 : f32 to vector<1x128xf32>
    %86 = arith.addf %84, %85 : vector<1x128xf32>
    %87 = vector.extract_strided_slice %76 {offsets = [0, 256], sizes = [1, 128], strides = [1, 1]} : vector<1x512xf32> to vector<1x128xf32>
    %88 = vector.extract_strided_slice %76 {offsets = [0, 384], sizes = [1, 128], strides = [1, 1]} : vector<1x512xf32> to vector<1x128xf32>
    %cst_38 = arith.constant 5.000000e-01 : f32
    %89 = vector.broadcast %cst_38 : f32 to vector<1x128xf32>
    %90 = arith.mulf %89, %88 : vector<1x128xf32>
    %cst_39 = arith.constant 5.000000e-01 : f32
    %91 = vector.broadcast %cst_39 : f32 to vector<1x128xf32>
    %92 = arith.addf %90, %91 : vector<1x128xf32>
    %93 = arith.mulf %86, %63 : vector<1x128xf32>
    %94 = arith.mulf %81, %87 : vector<1x128xf32>
    %95 = arith.addf %93, %94 : vector<1x128xf32>
    %96 = math.tanh %95 : vector<1x128xf32>
    %97 = arith.mulf %92, %96 : vector<1x128xf32>
    %c3 = arith.constant 3 : index
    %98 = memref.load %arg0[%c3] : memref<8xf32, #tpu.memory_space<smem>>
    %c0_40 = arith.constant 0 : index
    %c0_41 = arith.constant 0 : index
    %99 = vector.load %arg1[%c0_40, %c0_41] : memref<1x512xf32, #tpu.memory_space<vmem>>, vector<1x512xf32>
    %100 = vector.broadcast %98 : f32 to vector<1x512xf32>
    %101 = arith.mulf %100, %99 : vector<1x512xf32>
    %c0_42 = arith.constant 0 : index
    %c0_43 = arith.constant 0 : index
    %102 = vector.load %arg2[%c0_42, %c0_43] : memref<1x512xf32, #tpu.memory_space<vmem>>, vector<1x512xf32>
    %103 = arith.addf %101, %102 : vector<1x512xf32>
    %104 = arith.truncf %97 : vector<1x128xf32> to vector<1x128xbf16>
    %c0_44 = arith.constant 0 : index
    %c0_45 = arith.constant 0 : index
    %105 = vector.load %arg3[%c0_44, %c0_45] : memref<128x512xbf16, #tpu.memory_space<vmem>>, vector<128x512xbf16>
    %cst_46 = arith.constant dense<0.000000e+00> : vector<1x512xf32>
    %106 = tpu.matmul %104, %105, %cst_46 {dimension_numbers = #tpu.dot_dimension_numbers<[1], [0], [0], [1], [0, 0, 1, 1], [], []>} : vector<1x128xbf16>, vector<128x512xbf16>, vector<1x512xf32> -> vector<1x512xf32>
    %107 = arith.addf %103, %106 : vector<1x512xf32>
    %108 = math.tanh %107 : vector<1x512xf32>
    %109 = vector.extract_strided_slice %108 {offsets = [0, 0], sizes = [1, 128], strides = [1, 1]} : vector<1x512xf32> to vector<1x128xf32>
    %cst_47 = arith.constant 5.000000e-01 : f32
    %110 = vector.broadcast %cst_47 : f32 to vector<1x128xf32>
    %111 = arith.mulf %110, %109 : vector<1x128xf32>
    %cst_48 = arith.constant 5.000000e-01 : f32
    %112 = vector.broadcast %cst_48 : f32 to vector<1x128xf32>
    %113 = arith.addf %111, %112 : vector<1x128xf32>
    %114 = vector.extract_strided_slice %108 {offsets = [0, 128], sizes = [1, 128], strides = [1, 1]} : vector<1x512xf32> to vector<1x128xf32>
    %cst_49 = arith.constant 5.000000e-01 : f32
    %115 = vector.broadcast %cst_49 : f32 to vector<1x128xf32>
    %116 = arith.mulf %115, %114 : vector<1x128xf32>
    %cst_50 = arith.constant 5.000000e-01 : f32
    %117 = vector.broadcast %cst_50 : f32 to vector<1x128xf32>
    %118 = arith.addf %116, %117 : vector<1x128xf32>
    %119 = vector.extract_strided_slice %108 {offsets = [0, 256], sizes = [1, 128], strides = [1, 1]} : vector<1x512xf32> to vector<1x128xf32>
    %120 = vector.extract_strided_slice %108 {offsets = [0, 384], sizes = [1, 128], strides = [1, 1]} : vector<1x512xf32> to vector<1x128xf32>
    %cst_51 = arith.constant 5.000000e-01 : f32
    %121 = vector.broadcast %cst_51 : f32 to vector<1x128xf32>
    %122 = arith.mulf %121, %120 : vector<1x128xf32>
    %cst_52 = arith.constant 5.000000e-01 : f32
    %123 = vector.broadcast %cst_52 : f32 to vector<1x128xf32>
    %124 = arith.addf %122, %123 : vector<1x128xf32>
    %125 = arith.mulf %118, %95 : vector<1x128xf32>
    %126 = arith.mulf %113, %119 : vector<1x128xf32>
    %127 = arith.addf %125, %126 : vector<1x128xf32>
    %128 = math.tanh %127 : vector<1x128xf32>
    %129 = arith.mulf %124, %128 : vector<1x128xf32>
    %c4 = arith.constant 4 : index
    %130 = memref.load %arg0[%c4] : memref<8xf32, #tpu.memory_space<smem>>
    %c0_53 = arith.constant 0 : index
    %c0_54 = arith.constant 0 : index
    %131 = vector.load %arg1[%c0_53, %c0_54] : memref<1x512xf32, #tpu.memory_space<vmem>>, vector<1x512xf32>
    %132 = vector.broadcast %130 : f32 to vector<1x512xf32>
    %133 = arith.mulf %132, %131 : vector<1x512xf32>
    %c0_55 = arith.constant 0 : index
    %c0_56 = arith.constant 0 : index
    %134 = vector.load %arg2[%c0_55, %c0_56] : memref<1x512xf32, #tpu.memory_space<vmem>>, vector<1x512xf32>
    %135 = arith.addf %133, %134 : vector<1x512xf32>
    %136 = arith.truncf %129 : vector<1x128xf32> to vector<1x128xbf16>
    %c0_57 = arith.constant 0 : index
    %c0_58 = arith.constant 0 : index
    %137 = vector.load %arg3[%c0_57, %c0_58] : memref<128x512xbf16, #tpu.memory_space<vmem>>, vector<128x512xbf16>
    %cst_59 = arith.constant dense<0.000000e+00> : vector<1x512xf32>
    %138 = tpu.matmul %136, %137, %cst_59 {dimension_numbers = #tpu.dot_dimension_numbers<[1], [0], [0], [1], [0, 0, 1, 1], [], []>} : vector<1x128xbf16>, vector<128x512xbf16>, vector<1x512xf32> -> vector<1x512xf32>
    %139 = arith.addf %135, %138 : vector<1x512xf32>
    %140 = math.tanh %139 : vector<1x512xf32>
    %141 = vector.extract_strided_slice %140 {offsets = [0, 0], sizes = [1, 128], strides = [1, 1]} : vector<1x512xf32> to vector<1x128xf32>
    %cst_60 = arith.constant 5.000000e-01 : f32
    %142 = vector.broadcast %cst_60 : f32 to vector<1x128xf32>
    %143 = arith.mulf %142, %141 : vector<1x128xf32>
    %cst_61 = arith.constant 5.000000e-01 : f32
    %144 = vector.broadcast %cst_61 : f32 to vector<1x128xf32>
    %145 = arith.addf %143, %144 : vector<1x128xf32>
    %146 = vector.extract_strided_slice %140 {offsets = [0, 128], sizes = [1, 128], strides = [1, 1]} : vector<1x512xf32> to vector<1x128xf32>
    %cst_62 = arith.constant 5.000000e-01 : f32
    %147 = vector.broadcast %cst_62 : f32 to vector<1x128xf32>
    %148 = arith.mulf %147, %146 : vector<1x128xf32>
    %cst_63 = arith.constant 5.000000e-01 : f32
    %149 = vector.broadcast %cst_63 : f32 to vector<1x128xf32>
    %150 = arith.addf %148, %149 : vector<1x128xf32>
    %151 = vector.extract_strided_slice %140 {offsets = [0, 256], sizes = [1, 128], strides = [1, 1]} : vector<1x512xf32> to vector<1x128xf32>
    %152 = vector.extract_strided_slice %140 {offsets = [0, 384], sizes = [1, 128], strides = [1, 1]} : vector<1x512xf32> to vector<1x128xf32>
    %cst_64 = arith.constant 5.000000e-01 : f32
    %153 = vector.broadcast %cst_64 : f32 to vector<1x128xf32>
    %154 = arith.mulf %153, %152 : vector<1x128xf32>
    %cst_65 = arith.constant 5.000000e-01 : f32
    %155 = vector.broadcast %cst_65 : f32 to vector<1x128xf32>
    %156 = arith.addf %154, %155 : vector<1x128xf32>
    %157 = arith.mulf %150, %127 : vector<1x128xf32>
    %158 = arith.mulf %145, %151 : vector<1x128xf32>
    %159 = arith.addf %157, %158 : vector<1x128xf32>
    %160 = math.tanh %159 : vector<1x128xf32>
    %161 = arith.mulf %156, %160 : vector<1x128xf32>
    %c5 = arith.constant 5 : index
    %162 = memref.load %arg0[%c5] : memref<8xf32, #tpu.memory_space<smem>>
    %c0_66 = arith.constant 0 : index
    %c0_67 = arith.constant 0 : index
    %163 = vector.load %arg1[%c0_66, %c0_67] : memref<1x512xf32, #tpu.memory_space<vmem>>, vector<1x512xf32>
    %164 = vector.broadcast %162 : f32 to vector<1x512xf32>
    %165 = arith.mulf %164, %163 : vector<1x512xf32>
    %c0_68 = arith.constant 0 : index
    %c0_69 = arith.constant 0 : index
    %166 = vector.load %arg2[%c0_68, %c0_69] : memref<1x512xf32, #tpu.memory_space<vmem>>, vector<1x512xf32>
    %167 = arith.addf %165, %166 : vector<1x512xf32>
    %168 = arith.truncf %161 : vector<1x128xf32> to vector<1x128xbf16>
    %c0_70 = arith.constant 0 : index
    %c0_71 = arith.constant 0 : index
    %169 = vector.load %arg3[%c0_70, %c0_71] : memref<128x512xbf16, #tpu.memory_space<vmem>>, vector<128x512xbf16>
    %cst_72 = arith.constant dense<0.000000e+00> : vector<1x512xf32>
    %170 = tpu.matmul %168, %169, %cst_72 {dimension_numbers = #tpu.dot_dimension_numbers<[1], [0], [0], [1], [0, 0, 1, 1], [], []>} : vector<1x128xbf16>, vector<128x512xbf16>, vector<1x512xf32> -> vector<1x512xf32>
    %171 = arith.addf %167, %170 : vector<1x512xf32>
    %172 = math.tanh %171 : vector<1x512xf32>
    %173 = vector.extract_strided_slice %172 {offsets = [0, 0], sizes = [1, 128], strides = [1, 1]} : vector<1x512xf32> to vector<1x128xf32>
    %cst_73 = arith.constant 5.000000e-01 : f32
    %174 = vector.broadcast %cst_73 : f32 to vector<1x128xf32>
    %175 = arith.mulf %174, %173 : vector<1x128xf32>
    %cst_74 = arith.constant 5.000000e-01 : f32
    %176 = vector.broadcast %cst_74 : f32 to vector<1x128xf32>
    %177 = arith.addf %175, %176 : vector<1x128xf32>
    %178 = vector.extract_strided_slice %172 {offsets = [0, 128], sizes = [1, 128], strides = [1, 1]} : vector<1x512xf32> to vector<1x128xf32>
    %cst_75 = arith.constant 5.000000e-01 : f32
    %179 = vector.broadcast %cst_75 : f32 to vector<1x128xf32>
    %180 = arith.mulf %179, %178 : vector<1x128xf32>
    %cst_76 = arith.constant 5.000000e-01 : f32
    %181 = vector.broadcast %cst_76 : f32 to vector<1x128xf32>
    %182 = arith.addf %180, %181 : vector<1x128xf32>
    %183 = vector.extract_strided_slice %172 {offsets = [0, 256], sizes = [1, 128], strides = [1, 1]} : vector<1x512xf32> to vector<1x128xf32>
    %184 = vector.extract_strided_slice %172 {offsets = [0, 384], sizes = [1, 128], strides = [1, 1]} : vector<1x512xf32> to vector<1x128xf32>
    %cst_77 = arith.constant 5.000000e-01 : f32
    %185 = vector.broadcast %cst_77 : f32 to vector<1x128xf32>
    %186 = arith.mulf %185, %184 : vector<1x128xf32>
    %cst_78 = arith.constant 5.000000e-01 : f32
    %187 = vector.broadcast %cst_78 : f32 to vector<1x128xf32>
    %188 = arith.addf %186, %187 : vector<1x128xf32>
    %189 = arith.mulf %182, %159 : vector<1x128xf32>
    %190 = arith.mulf %177, %183 : vector<1x128xf32>
    %191 = arith.addf %189, %190 : vector<1x128xf32>
    %192 = math.tanh %191 : vector<1x128xf32>
    %193 = arith.mulf %188, %192 : vector<1x128xf32>
    %c6 = arith.constant 6 : index
    %194 = memref.load %arg0[%c6] : memref<8xf32, #tpu.memory_space<smem>>
    %c0_79 = arith.constant 0 : index
    %c0_80 = arith.constant 0 : index
    %195 = vector.load %arg1[%c0_79, %c0_80] : memref<1x512xf32, #tpu.memory_space<vmem>>, vector<1x512xf32>
    %196 = vector.broadcast %194 : f32 to vector<1x512xf32>
    %197 = arith.mulf %196, %195 : vector<1x512xf32>
    %c0_81 = arith.constant 0 : index
    %c0_82 = arith.constant 0 : index
    %198 = vector.load %arg2[%c0_81, %c0_82] : memref<1x512xf32, #tpu.memory_space<vmem>>, vector<1x512xf32>
    %199 = arith.addf %197, %198 : vector<1x512xf32>
    %200 = arith.truncf %193 : vector<1x128xf32> to vector<1x128xbf16>
    %c0_83 = arith.constant 0 : index
    %c0_84 = arith.constant 0 : index
    %201 = vector.load %arg3[%c0_83, %c0_84] : memref<128x512xbf16, #tpu.memory_space<vmem>>, vector<128x512xbf16>
    %cst_85 = arith.constant dense<0.000000e+00> : vector<1x512xf32>
    %202 = tpu.matmul %200, %201, %cst_85 {dimension_numbers = #tpu.dot_dimension_numbers<[1], [0], [0], [1], [0, 0, 1, 1], [], []>} : vector<1x128xbf16>, vector<128x512xbf16>, vector<1x512xf32> -> vector<1x512xf32>
    %203 = arith.addf %199, %202 : vector<1x512xf32>
    %204 = math.tanh %203 : vector<1x512xf32>
    %205 = vector.extract_strided_slice %204 {offsets = [0, 0], sizes = [1, 128], strides = [1, 1]} : vector<1x512xf32> to vector<1x128xf32>
    %cst_86 = arith.constant 5.000000e-01 : f32
    %206 = vector.broadcast %cst_86 : f32 to vector<1x128xf32>
    %207 = arith.mulf %206, %205 : vector<1x128xf32>
    %cst_87 = arith.constant 5.000000e-01 : f32
    %208 = vector.broadcast %cst_87 : f32 to vector<1x128xf32>
    %209 = arith.addf %207, %208 : vector<1x128xf32>
    %210 = vector.extract_strided_slice %204 {offsets = [0, 128], sizes = [1, 128], strides = [1, 1]} : vector<1x512xf32> to vector<1x128xf32>
    %cst_88 = arith.constant 5.000000e-01 : f32
    %211 = vector.broadcast %cst_88 : f32 to vector<1x128xf32>
    %212 = arith.mulf %211, %210 : vector<1x128xf32>
    %cst_89 = arith.constant 5.000000e-01 : f32
    %213 = vector.broadcast %cst_89 : f32 to vector<1x128xf32>
    %214 = arith.addf %212, %213 : vector<1x128xf32>
    %215 = vector.extract_strided_slice %204 {offsets = [0, 256], sizes = [1, 128], strides = [1, 1]} : vector<1x512xf32> to vector<1x128xf32>
    %216 = vector.extract_strided_slice %204 {offsets = [0, 384], sizes = [1, 128], strides = [1, 1]} : vector<1x512xf32> to vector<1x128xf32>
    %cst_90 = arith.constant 5.000000e-01 : f32
    %217 = vector.broadcast %cst_90 : f32 to vector<1x128xf32>
    %218 = arith.mulf %217, %216 : vector<1x128xf32>
    %cst_91 = arith.constant 5.000000e-01 : f32
    %219 = vector.broadcast %cst_91 : f32 to vector<1x128xf32>
    %220 = arith.addf %218, %219 : vector<1x128xf32>
    %221 = arith.mulf %214, %191 : vector<1x128xf32>
    %222 = arith.mulf %209, %215 : vector<1x128xf32>
    %223 = arith.addf %221, %222 : vector<1x128xf32>
    %224 = math.tanh %223 : vector<1x128xf32>
    %225 = arith.mulf %220, %224 : vector<1x128xf32>
    %c7 = arith.constant 7 : index
    %226 = memref.load %arg0[%c7] : memref<8xf32, #tpu.memory_space<smem>>
    %c0_92 = arith.constant 0 : index
    %c0_93 = arith.constant 0 : index
    %227 = vector.load %arg1[%c0_92, %c0_93] : memref<1x512xf32, #tpu.memory_space<vmem>>, vector<1x512xf32>
    %228 = vector.broadcast %226 : f32 to vector<1x512xf32>
    %229 = arith.mulf %228, %227 : vector<1x512xf32>
    %c0_94 = arith.constant 0 : index
    %c0_95 = arith.constant 0 : index
    %230 = vector.load %arg2[%c0_94, %c0_95] : memref<1x512xf32, #tpu.memory_space<vmem>>, vector<1x512xf32>
    %231 = arith.addf %229, %230 : vector<1x512xf32>
    %232 = arith.truncf %225 : vector<1x128xf32> to vector<1x128xbf16>
    %c0_96 = arith.constant 0 : index
    %c0_97 = arith.constant 0 : index
    %233 = vector.load %arg3[%c0_96, %c0_97] : memref<128x512xbf16, #tpu.memory_space<vmem>>, vector<128x512xbf16>
    %cst_98 = arith.constant dense<0.000000e+00> : vector<1x512xf32>
    %234 = tpu.matmul %232, %233, %cst_98 {dimension_numbers = #tpu.dot_dimension_numbers<[1], [0], [0], [1], [0, 0, 1, 1], [], []>} : vector<1x128xbf16>, vector<128x512xbf16>, vector<1x512xf32> -> vector<1x512xf32>
    %235 = arith.addf %231, %234 : vector<1x512xf32>
    %236 = math.tanh %235 : vector<1x512xf32>
    %237 = vector.extract_strided_slice %236 {offsets = [0, 0], sizes = [1, 128], strides = [1, 1]} : vector<1x512xf32> to vector<1x128xf32>
    %cst_99 = arith.constant 5.000000e-01 : f32
    %238 = vector.broadcast %cst_99 : f32 to vector<1x128xf32>
    %239 = arith.mulf %238, %237 : vector<1x128xf32>
    %cst_100 = arith.constant 5.000000e-01 : f32
    %240 = vector.broadcast %cst_100 : f32 to vector<1x128xf32>
    %241 = arith.addf %239, %240 : vector<1x128xf32>
    %242 = vector.extract_strided_slice %236 {offsets = [0, 128], sizes = [1, 128], strides = [1, 1]} : vector<1x512xf32> to vector<1x128xf32>
    %cst_101 = arith.constant 5.000000e-01 : f32
    %243 = vector.broadcast %cst_101 : f32 to vector<1x128xf32>
    %244 = arith.mulf %243, %242 : vector<1x128xf32>
    %cst_102 = arith.constant 5.000000e-01 : f32
    %245 = vector.broadcast %cst_102 : f32 to vector<1x128xf32>
    %246 = arith.addf %244, %245 : vector<1x128xf32>
    %247 = vector.extract_strided_slice %236 {offsets = [0, 256], sizes = [1, 128], strides = [1, 1]} : vector<1x512xf32> to vector<1x128xf32>
    %248 = vector.extract_strided_slice %236 {offsets = [0, 384], sizes = [1, 128], strides = [1, 1]} : vector<1x512xf32> to vector<1x128xf32>
    %cst_103 = arith.constant 5.000000e-01 : f32
    %249 = vector.broadcast %cst_103 : f32 to vector<1x128xf32>
    %250 = arith.mulf %249, %248 : vector<1x128xf32>
    %cst_104 = arith.constant 5.000000e-01 : f32
    %251 = vector.broadcast %cst_104 : f32 to vector<1x128xf32>
    %252 = arith.addf %250, %251 : vector<1x128xf32>
    %253 = arith.mulf %246, %223 : vector<1x128xf32>
    %254 = arith.mulf %241, %247 : vector<1x128xf32>
    %255 = arith.addf %253, %254 : vector<1x128xf32>
    %256 = math.tanh %255 : vector<1x128xf32>
    %257 = arith.mulf %252, %256 : vector<1x128xf32>
    %c0_105 = arith.constant 0 : index
    %c0_106 = arith.constant 0 : index
    %258 = vector.load %arg4[%c0_105, %c0_106] : memref<1x128xf32, #tpu.memory_space<vmem>>, vector<1x128xf32>
    %259 = arith.mulf %257, %258 : vector<1x128xf32>
    %cst_107 = arith.constant dense<0.000000e+00> : vector<1xf32>
    %260 = vector.multi_reduction <add>, %259, %cst_107 [1] : vector<1x128xf32> to vector<1xf32>
    %261 = vector.shape_cast %260 : vector<1xf32> to vector<1x1xf32>
    %c0_108 = arith.constant 0 : index
    %c0_109 = arith.constant 0 : index
    %262 = vector.load %arg5[%c0_108, %c0_109] : memref<1x128xf32, #tpu.memory_space<vmem>>, vector<1x128xf32>
    %263 = vector.broadcast %261 : vector<1x1xf32> to vector<1x128xf32>
    %264 = arith.addf %263, %262 : vector<1x128xf32>
    %c0_110 = arith.constant 0 : index
    %c0_111 = arith.constant 0 : index
    %265 = vector.load %arg6[%c0_110, %c0_111] : memref<1x128xf32, #tpu.memory_space<vmem>>, vector<1x128xf32>
    tpu.vector_store %arg6[%c0_110, %c0_111], %264 {strides = array<i32>} : memref<1x128xf32, #tpu.memory_space<vmem>>, vector<1x128xf32>,
    return
  }
}

</mosaic_0001>

<bundles_post_ra>
// kernel: _lambda_.1
= control target key start
LH: loop header
LB: loop body
LE: loop exit
PB: predicated region body
PF: predicated region fallthrough
CT: control target
= control target key end

     0   :  { %11 = vsyncpa [#allocation5], 0  ;;  %s1780_s0 = inlined_call_operand.hbm [shape: f32[8], index: 0, kind: input, shape index: {}]   ;;  %s1781_s1 = inlined_call_operand.hbm [shape: f32[1,512], index: 1, kind: input, shape index: {}]   ;;  %s1782_s2 = inlined_call_operand.hbm [shape: f32[1,512], index: 2, kind: input, shape index: {}]   ;;  %s1783_s3 = inlined_call_operand.hbm [shape: bf16[128,512], index: 3, kind: input, shape index: {}]   ;;  %s1784_s4 = inlined_call_operand.vmem [shape: f32[1,128], index: 4, kind: input, shape index: {}]   ;;  %s1785_s5 = inlined_call_operand.vmem [shape: f32[1,128], index: 5, kind: input, shape index: {}]   ;;  %s1786_s6 = inlined_call_operand.hbm [shape: f32[1,128], index: 6, kind: output, shape index: {}]  }
   0x1   :  { %12 = vsyncpa [#allocation3], 0 }
   0x2   :  { %13 = vsyncpa [#allocation8], 0  ;;  %s40_s23 = sshll.u32 %s1782_s2, 4  ;;  %s41_s23 = int_to_ptr.hbm [resolvable:$true] %s40_s23 }
   0x3   :  { %14 = vsyncpa [#allocation4], 0  ;;  %s1331_s24 = smov [#allocation7]   ;;  %s20_s28 = sshll.u32 %s1780_s0, 4  ;;  %s21_s28 = int_to_ptr.hbm [resolvable:$true] %s20_s28 }
   0x4   :  { %s42_s25 = sshll.u32 %s1331_s24, 4  ;;  %s1332_s29 = smov [#allocation2]   ;;  %s43_s25 = int_to_ptr.vmem [resolvable:$true] %s42_s25 }
   0x5   :  { %45 = dma.hbm_to_vmem [thread:$0]  %s41_s23, 64, %s43_s25, [#allocation8]  }
   0x6   :  { %23 = dma.hbm_to_smem %s21_s28, 16, %s1332_s29, [#allocation5]  }
   0x7   :  { %s29_s8 = sshll.u32 %s1781_s1, 4  ;;  %s1333_s9 = smov [#allocation6]   ;;  %s30_s8 = int_to_ptr.hbm [resolvable:$true] %s29_s8 }
   0x8   :  { %s31_s2 = sshll.u32 %s1333_s9, 4  ;;  %s50_s12 = sshll.u32 %s1783_s3, 4  ;;  %s32_s2 = int_to_ptr.vmem [resolvable:$true] %s31_s2  ;;  %s51_s12 = int_to_ptr.hbm [resolvable:$true] %s50_s12 }
   0x9   :  { %34 = dma.hbm_to_vmem [thread:$0]  %s30_s8, 64, %s32_s2, [#allocation3]  }
   0xa   :  { %s1334_s13 = smov [#allocation9]   ;;  %s1335_s14 = smov 256  }
   0xb   :  { %s52_s0 = sshll.u32 %s1334_s13, 4  ;;  %s1336_s15 = smov 16   ;;  %s53_s0 = int_to_ptr.vmem [resolvable:$true] %s52_s0 }
   0xc   :  { %58 = dma.hbm_to_vmem [thread:$0]  %s51_s12, 4096, %s53_s0, [#allocation8], %s1335_s14, %s1335_s14, %s1336_s15  }
   0xd   :  { %1323 = dma.done.wait [#allocation5], 16  }
   0xe   :  { %1324 = vsyncadd [#allocation5], 4294967280 }
   0xf   :  { %1325 = dma.done.wait [#allocation3], 64  }
  0x10   :  { %1326 = vsyncadd [#allocation3], 4294967232 }
  0x11   :  { %1327 = dma.done.wait [#allocation8], 4160  }
  0x12   :  { %1328 = vsyncadd [#allocation8], 4294963136 }
  0x13   :  { %79 = sfence }
  0x14   :  { %v1122_v0 = vld [vmem:[#allocation9 + $0xe0] sm:$0xf]  ;;  %v1173_v1 = vld [vmem:[#allocation9 + $0xec] sm:$0xf0]  ;;  %v1171_v2 = vld [vmem:[#allocation9 + $0xe4] sm:$0xf] }
  0x15   :  { %v1386_v3 = vor.u32 %v1173_v1, %v1122_v0  ;;  %v1124_v4 = vld [vmem:[#allocation9 + $0xf0] sm:$0xf0]  ;;  %v1130_v5 = vld [vmem:[#allocation9 + $0xe8] sm:$0xf]  ;;  %v1174_v6 = vld [vmem:[#allocation9 + $0xf4] sm:$0xf0] }
  0x16   :  { %v1388_v7 = vor.u32 %v1171_v2, %v1124_v4  ;;  %v1390_v8 = vor.u32 %v1174_v6, %v1130_v5  ;;  %v1172_v9 = vld [vmem:[#allocation9 + $0xec] sm:$0xf]  ;;  %v1132_v10 = vld [vmem:[#allocation9 + $0xf8] sm:$0xf0]  ;;  %v1106_v11 = vld [vmem:[#allocation9 + $0xc0] sm:$0xf] }
  0x17   :  { %279 = vmatpush.bf16.msra.mxu0 %v1386_v3  ;;  %v1393_v12 = vor.u32 %v1172_v9, %v1132_v10  ;;  %v1169_v13 = vld [vmem:[#allocation9 + $0xcc] sm:$0xf0]  ;;  %v1167_v14 = vld [vmem:[#allocation9 + $0xc4] sm:$0xf]  ;;  %v1108_v15 = vld [vmem:[#allocation9 + $0xd0] sm:$0xf0] }
  0x18   :  { %292 = vmatpush.bf16.msra.mxu1 %v1388_v7  ;;  %305 = vmatpush.bf16.msra.mxu2 %v1390_v8  ;;  %v1397_v16 = vor.u32 %v1169_v13, %v1106_v11  ;;  %v1399_v17 = vor.u32 %v1167_v14, %v1108_v15  ;;  %v1114_v18 = vld [vmem:[#allocation9 + $0xc8] sm:$0xf]  ;;  %v1170_v19 = vld [vmem:[#allocation9 + $0xd4] sm:$0xf0]  ;;  %v1168_v20 = vld [vmem:[#allocation9 + $0xcc] sm:$0xf] }
  0x19   :  { %318 = vmatpush.bf16.msra.mxu3 %v1393_v12  ;;  %v1402_v21 = vor.u32 %v1170_v19, %v1114_v18  ;;  %v1116_v22 = vld [vmem:[#allocation9 + $0xd8] sm:$0xf0]  ;;  %v1090_v23 = vld [vmem:[#allocation9 + $0xa0] sm:$0xf]  ;;  %v1165_v24 = vld [vmem:[#allocation9 + $0xac] sm:$0xf0] }
  0x1a   :  { %v1404_v25 = vor.u32 %v1168_v20, %v1116_v22  ;;  %v1163_v26 = vld [vmem:[#allocation9 + $0xa4] sm:$0xf]  ;;  %v1092_v27 = vld [vmem:[#allocation9 + $0xb0] sm:$0xf0]  ;;  %v1098_v28 = vld [vmem:[#allocation9 + $0xa8] sm:$0xf]  ;;  %v1407_v29 = vor.u32 %v1165_v24, %v1090_v23 }
  0x1b   :  { %280 = vmatpush.bf16.msra.mxu0 %v1397_v16  ;;  %v1166_v30 = vld [vmem:[#allocation9 + $0xb4] sm:$0xf0]  ;;  %v1164_v31 = vld [vmem:[#allocation9 + $0xac] sm:$0xf]  ;;  %v1100_v32 = vld [vmem:[#allocation9 + $0xb8] sm:$0xf0]  ;;  %v1411_v33 = vor.u32 %v1163_v26, %v1092_v27 }
  0x1c   :  { %293 = vmatpush.bf16.msra.mxu1 %v1399_v17  ;;  %306 = vmatpush.bf16.msra.mxu2 %v1402_v21  ;;  %v1413_v34 = vor.u32 %v1166_v30, %v1098_v28  ;;  %v1074_v35 = vld [vmem:[#allocation9 + $0x80] sm:$0xf]  ;;  %v1161_v36 = vld [vmem:[#allocation9 + $0x8c] sm:$0xf0]  ;;  %v1159_v37 = vld [vmem:[#allocation9 + $0x84] sm:$0xf]  ;;  %v1416_v38 = vor.u32 %v1164_v31, %v1100_v32 }
  0x1d   :  { %319 = vmatpush.bf16.msra.mxu3 %v1404_v25  ;;  %v1076_v39 = vld [vmem:[#allocation9 + $0x90] sm:$0xf0]  ;;  %v1082_v40 = vld [vmem:[#allocation9 + $0x88] sm:$0xf]  ;;  %v1162_v41 = vld [vmem:[#allocation9 + $0x94] sm:$0xf0]  ;;  %v1419_v44 = vor.u32 %v1161_v36, %v1074_v35 }
  0x1e   :  { %v1160_v42 = vld [vmem:[#allocation9 + $0x8c] sm:$0xf]  ;;  %v1084_v43 = vld [vmem:[#allocation9 + $0x98] sm:$0xf0]  ;;  %v1423_v45 = vor.u32 %v1159_v37, %v1076_v39  ;;  %v1425_v46 = vor.u32 %v1162_v41, %v1082_v40  ;;  %v1058_v47 = vld [vmem:[#allocation9 + $0x60] sm:$0xf] }
  0x1f   :  { %281 = vmatpush.bf16.msra.mxu0 %v1407_v29  ;;  %v1157_v48 = vld [vmem:[#allocation9 + $0x6c] sm:$0xf0]  ;;  %v1155_v49 = vld [vmem:[#allocation9 + $0x64] sm:$0xf]  ;;  %v1428_v50 = vor.u32 %v1160_v42, %v1084_v43  ;;  %v1060_v51 = vld [vmem:[#allocation9 + $0x70] sm:$0xf0] }
  0x20   :  { %294 = vmatpush.bf16.msra.mxu1 %v1411_v33  ;;  %307 = vmatpush.bf16.msra.mxu2 %v1413_v34  ;;  %v1066_v52 = vld [vmem:[#allocation9 + $0x68] sm:$0xf]  ;;  %v1158_v53 = vld [vmem:[#allocation9 + $0x74] sm:$0xf0]  ;;  %v1156_v54 = vld [vmem:[#allocation9 + $0x6c] sm:$0xf]  ;;  %v1431_v56 = vor.u32 %v1157_v48, %v1058_v47  ;;  %v1435_v57 = vor.u32 %v1155_v49, %v1060_v51 }
  0x21   :  { %320 = vmatpush.bf16.msra.mxu3 %v1416_v38  ;;  %v1068_v55 = vld [vmem:[#allocation9 + $0x78] sm:$0xf0]  ;;  %v1437_v58 = vor.u32 %v1158_v53, %v1066_v52  ;;  %v1042_v59 = vld [vmem:[#allocation9 + $0x40] sm:$0xf]  ;;  %v1153_v60 = vld [vmem:[#allocation9 + $0x4c] sm:$0xf0] }
  0x22   :  { %v1151_v61 = vld [vmem:[#allocation9 + $0x44] sm:$0xf]  ;;  %v1440_v62 = vor.u32 %v1156_v54, %v1068_v55  ;;  %v1044_v63 = vld [vmem:[#allocation9 + $0x50] sm:$0xf0]  ;;  %v1050_v0 = vld [vmem:[#allocation9 + $0x48] sm:$0xf]  ;;  %v1443_v5 = vor.u32 %v1153_v60, %v1042_v59 }
  0x23   :  { %282 = vmatpush.bf16.msra.mxu0 %v1419_v44  ;;  %v1154_v1 = vld [vmem:[#allocation9 + $0x54] sm:$0xf0]  ;;  %v1152_v2 = vld [vmem:[#allocation9 + $0x4c] sm:$0xf]  ;;  %v1052_v4 = vld [vmem:[#allocation9 + $0x58] sm:$0xf0]  ;;  %v1447_v6 = vor.u32 %v1151_v61, %v1044_v63 }
  0x24   :  { %295 = vmatpush.bf16.msra.mxu1 %v1423_v45  ;;  %308 = vmatpush.bf16.msra.mxu2 %v1425_v46  ;;  %v1449_v9 = vor.u32 %v1154_v1, %v1050_v0  ;;  %v1026_v10 = vld [vmem:[#allocation9 + $0x20] sm:$0xf]  ;;  %v1149_v11 = vld [vmem:[#allocation9 + $0x2c] sm:$0xf0]  ;;  %v1147_v13 = vld [vmem:[#allocation9 + $0x24] sm:$0xf]  ;;  %v1452_v14 = vor.u32 %v1152_v2, %v1052_v4 }
  0x25   :  { %321 = vmatpush.bf16.msra.mxu3 %v1428_v50  ;;  %v1028_v15 = vld [vmem:[#allocation9 + $0x30] sm:$0xf0]  ;;  %v1034_v18 = vld [vmem:[#allocation9 + $0x28] sm:$0xf]  ;;  %v1150_v19 = vld [vmem:[#allocation9 + $0x34] sm:$0xf0]  ;;  %v1455_v23 = vor.u32 %v1149_v11, %v1026_v10 }
  0x26   :  { %v1148_v20 = vld [vmem:[#allocation9 + $0x2c] sm:$0xf]  ;;  %v1036_v22 = vld [vmem:[#allocation9 + $0x38] sm:$0xf0]  ;;  %v1459_v24 = vor.u32 %v1147_v13, %v1028_v15  ;;  %v1461_v26 = vor.u32 %v1150_v19, %v1034_v18  ;;  %v1010_v27 = vld [vmem:[#allocation9] sm:$0xf] }
  0x27   :  { %283 = vmatpush.bf16.msra.mxu0 %v1431_v56  ;;  %v1145_v28 = vld [vmem:[#allocation9 + $0xc] sm:$0xf0]  ;;  %v1143_v30 = vld [vmem:[#allocation9 + $0x4] sm:$0xf]  ;;  %v1464_v31 = vor.u32 %v1148_v20, %v1036_v22  ;;  %v1012_v32 = vld [vmem:[#allocation9 + $0x10] sm:$0xf0] }
  0x28   :  { %296 = vmatpush.bf16.msra.mxu1 %v1435_v57  ;;  %309 = vmatpush.bf16.msra.mxu2 %v1437_v58  ;;  %v1018_v35 = vld [vmem:[#allocation9 + $0x8] sm:$0xf]  ;;  %v1146_v36 = vld [vmem:[#allocation9 + $0x14] sm:$0xf0]  ;;  %v1144_v37 = vld [vmem:[#allocation9 + $0xc] sm:$0xf]  ;;  %v1467_v40 = vor.u32 %v1145_v28, %v1010_v27  ;;  %v1471_v41 = vor.u32 %v1143_v30, %v1012_v32 }
  0x29   :  { %322 = vmatpush.bf16.msra.mxu3 %v1440_v62  ;;  %v1020_v39 = vld [vmem:[#allocation9 + $0x18] sm:$0xf0]  ;;  %v1473_v42 = vor.u32 %v1146_v36, %v1018_v35  ;;  %v1337_v47 = vmov 0   ;;  %s81_s1 = sld [smem:[#allocation2]]  ;;  %v1546_v51 = vld [vmem:[#allocation6] sm:$0xf] }
  0x2a   :  { %v1476_v43 = vor.u32 %v1144_v37, %v1020_v39  ;;  %vm338_vm0 = vcmask 1040384   ;;  %v1549_v55 = vld [vmem:[#allocation7] sm:$0xf]  ;;  %vm340_vm1 = vcmask 1042434   ;;  %vm342_vm2 = vcmask 1041408   ;;  %s1136_s3 = sld [smem:[#allocation2 + $0x1]] }
  0x2b   :  { %284 = vmatpush.bf16.msra.mxu0 %v1443_v5  ;;  %s1137_s16 = sld [smem:[#allocation2 + $0x2]]  ;;  %s1338_s26 = smov [#allocation10]  }
  0x2c   :  { %297 = vmatpush.bf16.msra.mxu1 %v1447_v6  ;;  %310 = vmatpush.bf16.msra.mxu2 %v1449_v9  ;;  %s1138_s17 = sld [smem:[#allocation2 + $0x3]]  ;;  %s994_s27 = sshll.u32 %s1338_s26, 4  ;;  %s995_s27 = int_to_ptr.vmem [resolvable:$true] %s994_s27 }
  0x2d   :  { %323 = vmatpush.bf16.msra.mxu3 %v1452_v14  ;;  %s1139_s18 = sld [smem:[#allocation2 + $0x4]]  ;;  %s996_s30 = sshll.u32 %s1786_s6, 4  ;;  %s997_s30 = int_to_ptr.hbm [resolvable:$true] %s996_s30 }
  0x2e   :  { %s1140_s19 = sld [smem:[#allocation2 + $0x5]] }
  0x2f   :  { %285 = vmatpush.bf16.msra.mxu0 %v1455_v23  ;;  %v83_v52 = vstv %s81_s1  ;;  %s1141_s20 = sld [smem:[#allocation2 + $0x6]] }
  0x30   :  { %298 = vmatpush.bf16.msra.mxu1 %v1459_v24  ;;  %311 = vmatpush.bf16.msra.mxu2 %v1461_v26  ;;  %v84_v54 = vmul.f32 %v83_v52, %v1546_v51  ;;  %s1142_s21 = sld [smem:[#allocation2 + $0x7]] }
  0x31   :  { %324 = vmatpush.bf16.msra.mxu3 %v1464_v31 }
  0x32   :  { %v86_v1 = vadd.f32 %v1549_v55, %v84_v54 }
  0x33   :  { %286 = vmatpush.bf16.msra.mxu0 %v1467_v40 }
  0x34   :  { %299 = vmatpush.bf16.msra.mxu1 %v1471_v41  ;;  %312 = vmatpush.bf16.msra.mxu2 %v1473_v42 }
  0x35   :  { %325 = vmatpush.bf16.msra.mxu3 %v1476_v43 }
  0x36   :  { %287 = vmatmul.bf16.vlgmr.msra.gmra.mxu0 %v1337_v47 }
  0x37   :  { %370 = vmatpush.bf16.msrb.mxu0 %v1386_v3  ;;  %300 = vmatmul.bf16.vlgmr.msra.gmra.mxu1 %v1337_v47 }
  0x38   :  { %383 = vmatpush.bf16.msrb.mxu1 %v1388_v7  ;;  %313 = vmatmul.bf16.vlgmr.msra.gmra.mxu2 %v1337_v47 }
  0x39   :  { %326 = vmatmul.bf16.vlgmr.msra.gmra.mxu3 %v1337_v47  ;;  %396 = vmatpush.bf16.msrb.mxu2 %v1390_v8 }
  0x3a   :  { %409 = vmatpush.bf16.msrb.mxu3 %v1393_v12 }
  0x3b   :  { %371 = vmatpush.bf16.msrb.mxu0 %v1397_v16 }
  0x3c   :  { %384 = vmatpush.bf16.msrb.mxu1 %v1399_v17 }
  0x3d   :  { %397 = vmatpush.bf16.msrb.mxu2 %v1402_v21 }
  0x3e   :  { %410 = vmatpush.bf16.msrb.mxu3 %v1404_v25 }
  0x3f   :  { %372 = vmatpush.bf16.msrb.mxu0 %v1407_v29 }
  0x40   :  { %385 = vmatpush.bf16.msrb.mxu1 %v1411_v33 }
  0x41   :  { %398 = vmatpush.bf16.msrb.mxu2 %v1413_v34 }
  0x42   :  { %411 = vmatpush.bf16.msrb.mxu3 %v1416_v38 }
  0x43   :  { %373 = vmatpush.bf16.msrb.mxu0 %v1419_v44 }
  0x44   :  { %386 = vmatpush.bf16.msrb.mxu1 %v1423_v45 }
  0x45   :  { %399 = vmatpush.bf16.msrb.mxu2 %v1425_v46 }
  0x46   :  { %412 = vmatpush.bf16.msrb.mxu3 %v1428_v50 }
  0x47   :  { %374 = vmatpush.bf16.msrb.mxu0 %v1431_v56 }
  0x48   :  { %387 = vmatpush.bf16.msrb.mxu1 %v1435_v57 }
  0x49   :  { %400 = vmatpush.bf16.msrb.mxu2 %v1437_v58 }
  0x4a   :  { %413 = vmatpush.bf16.msrb.mxu3 %v1440_v62 }
  0x4b   :  { %375 = vmatpush.bf16.msrb.mxu0 %v1443_v5 }
  0x4c   :  { %388 = vmatpush.bf16.msrb.mxu1 %v1447_v6 }
  0x4d   :  { %401 = vmatpush.bf16.msrb.mxu2 %v1449_v9 }
  0x4e   :  { %414 = vmatpush.bf16.msrb.mxu3 %v1452_v14 }
  0x4f   :  { %376 = vmatpush.bf16.msrb.mxu0 %v1455_v23 }
  0x50   :  { %389 = vmatpush.bf16.msrb.mxu1 %v1459_v24 }
  0x51   :  { %402 = vmatpush.bf16.msrb.mxu2 %v1461_v26 }
  0x52   :  { %415 = vmatpush.bf16.msrb.mxu3 %v1464_v31 }
  0x53   :  { %377 = vmatpush.bf16.msrb.mxu0 %v1467_v40 }
  0x54   :  { %390 = vmatpush.bf16.msrb.mxu1 %v1471_v41 }
  0x55   :  { %403 = vmatpush.bf16.msrb.mxu2 %v1473_v42 }
  0x56   :  { %416 = vmatpush.bf16.msrb.mxu3 %v1476_v43 }
  0x57   :  { %458 = vmatpush.bf16.msra.mxu0 %v1386_v3 }
  0x58   :  { %471 = vmatpush.bf16.msra.mxu1 %v1388_v7 }
  0x59   :  { %484 = vmatpush.bf16.msra.mxu2 %v1390_v8 }
  0x5a   :  { %497 = vmatpush.bf16.msra.mxu3 %v1393_v12 }
  0x5b   :  { %459 = vmatpush.bf16.msra.mxu0 %v1397_v16 }
  0x5c   :  { %472 = vmatpush.bf16.msra.mxu1 %v1399_v17 }
  0x5d   :  { %485 = vmatpush.bf16.msra.mxu2 %v1402_v21 }
  0x5e   :  { %498 = vmatpush.bf16.msra.mxu3 %v1404_v25 }
  0x5f   :  { %460 = vmatpush.bf16.msra.mxu0 %v1407_v29 }
  0x60   :  { %473 = vmatpush.bf16.msra.mxu1 %v1411_v33 }
  0x61   :  { %486 = vmatpush.bf16.msra.mxu2 %v1413_v34 }
  0x62   :  { %499 = vmatpush.bf16.msra.mxu3 %v1416_v38 }
  0x63   :  { %461 = vmatpush.bf16.msra.mxu0 %v1419_v44 }
  0x64   :  { %474 = vmatpush.bf16.msra.mxu1 %v1423_v45 }
  0x65   :  { %487 = vmatpush.bf16.msra.mxu2 %v1425_v46 }
  0x66   :  { %500 = vmatpush.bf16.msra.mxu3 %v1428_v50 }
  0x67   :  { %462 = vmatpush.bf16.msra.mxu0 %v1431_v56 }
  0x68   :  { %475 = vmatpush.bf16.msra.mxu1 %v1435_v57 }
  0x69   :  { %488 = vmatpush.bf16.msra.mxu2 %v1437_v58 }
  0x6a   :  { %501 = vmatpush.bf16.msra.mxu3 %v1440_v62 }
  0x6b   :  { %463 = vmatpush.bf16.msra.mxu0 %v1443_v5 }
  0x6c   :  { %476 = vmatpush.bf16.msra.mxu1 %v1447_v6 }
  0x6d   :  { %489 = vmatpush.bf16.msra.mxu2 %v1449_v9 }
  0x6e   :  { %502 = vmatpush.bf16.msra.mxu3 %v1452_v14 }
  0x6f   :  { %464 = vmatpush.bf16.msra.mxu0 %v1455_v23 }
  0x70   :  { %477 = vmatpush.bf16.msra.mxu1 %v1459_v24 }
  0x71   :  { %490 = vmatpush.bf16.msra.mxu2 %v1461_v26 }
  0x72   :  { %503 = vmatpush.bf16.msra.mxu3 %v1464_v31 }
  0x73   :  { %465 = vmatpush.bf16.msra.mxu0 %v1467_v40 }
  0x74   :  { %478 = vmatpush.bf16.msra.mxu1 %v1471_v41 }
  0x75   :  { %491 = vmatpush.bf16.msra.mxu2 %v1473_v42 }
  0x76   :  { %504 = vmatpush.bf16.msra.mxu3 %v1476_v43 }
  0xb3   :  { %v288_v48 = vpop.f32.mrf.mxu0 }
  0xb4   :  { %v301_v49 = vpop.f32.mrf.mxu1 }
  0xb5   :  { %v335_v53 = vrot.slane %v301_v49, 7 }
  0xb7   :  { %v339_v0 = vsel %vm338_vm0, %v288_v48, %v335_v53 }
  0xbb   :  { %v314_v59 = vpop.f32.mrf.mxu2  ;;  %v290_v63 = vpop.f32.mrf.mxu0 }
  0xbc   :  { %v336_v60 = vrot.slane %v314_v59, 6  ;;  %v327_v61 = vpop.f32.mrf.mxu3  ;;  %v303_v4 = vpop.f32.mrf.mxu1 }
  0xbd   :  { %v337_v2 = vrot.slane %v327_v61, 5 }
  0xbf   :  { %v341_v10 = vsel %vm340_vm1, %v336_v60, %v337_v2  ;;  %v366_v60 = vstv %s1136_s3 }
  0xc0   :  { %v343_v11 = vsel %vm342_vm2, %v339_v0, %v341_v10  ;;  %v367_v61 = vmul.f32 %v366_v60, %v1546_v51 }
  0xc1   :  { %v345_v13 = vadd.f32 %v343_v11, %v86_v1 }
  0xc2   :  { %v368_v4 = vadd.f32 %v367_v61, %v1549_v55 }
  0xc3   :  { %1183 = vtanh.f32 %v345_v13  ;;  %v316_v15 = vpop.f32.mrf.mxu2 }
  0xc4   :  { %v329_v18 = vpop.f32.mrf.mxu3 }
  0xc9   :  { %v1184_v19 = vpop.eup %1183 }
  0xca   :  { %v347_v20 = vmul.f32 0.5, %v1184_v19  ;;  %v350_v22 = vrot.slane %v1184_v19, 1  ;;  %v359_v32 = vrot.slane %v1184_v19, 2  ;;  %v354_v37 = vrot.slane %v1184_v19, 3 }
  0xcc   :  { %v348_v27 = vadd.f32 0.5, %v347_v20  ;;  %v352_v28 = vmul.f32 0.5, %v350_v22  ;;  %v356_v47 = vmul.f32 0.5, %v354_v37 }
  0xce   :  { %v353_v30 = vadd.f32 0.5, %v352_v28  ;;  %v361_v36 = vmul.f32 %v359_v32, %v348_v27  ;;  %v357_v48 = vadd.f32 0.5, %v356_v47 }
  0xd0   :  { %v358_v35 = vmul.f32 0.0, %v353_v30 }
  0xd2   :  { %v1555_v39 = vadd.f32 %v361_v36, %v358_v35 }
  0xd4   :  { %1185 = vtanh.f32 %v1555_v39 }
  0xda   :  { %v1186_v49 = vpop.eup %1185 }
  0xdb   :  { %v364_v52 = vmul.f32 %v1186_v49, %v357_v48 }
  0xdd   :  { %v369_v53 = vpack.c.bf16 %v364_v52, %v364_v52 }
  0xdf   :  { %378 = vmatmul.bf16.vlgmr.msrb.gmra.mxu0 %v369_v53  ;;  %391 = vmatmul.bf16.vlgmr.msrb.gmra.mxu1 %v369_v53 }
  0xe0   :  { %404 = vmatmul.bf16.vlgmr.msrb.gmra.mxu2 %v369_v53  ;;  %417 = vmatmul.bf16.vlgmr.msrb.gmra.mxu3 %v369_v53 }
  0xe1   :  { %546 = vmatpush.bf16.msrb.mxu0 %v1386_v3  ;;  %559 = vmatpush.bf16.msrb.mxu1 %v1388_v7 }
  0xe2   :  { %572 = vmatpush.bf16.msrb.mxu2 %v1390_v8  ;;  %585 = vmatpush.bf16.msrb.mxu3 %v1393_v12 }
  0xe5   :  { %547 = vmatpush.bf16.msrb.mxu0 %v1397_v16  ;;  %560 = vmatpush.bf16.msrb.mxu1 %v1399_v17 }
  0xe6   :  { %573 = vmatpush.bf16.msrb.mxu2 %v1402_v21  ;;  %586 = vmatpush.bf16.msrb.mxu3 %v1404_v25 }
  0xe9   :  { %548 = vmatpush.bf16.msrb.mxu0 %v1407_v29  ;;  %561 = vmatpush.bf16.msrb.mxu1 %v1411_v33 }
  0xea   :  { %574 = vmatpush.bf16.msrb.mxu2 %v1413_v34  ;;  %587 = vmatpush.bf16.msrb.mxu3 %v1416_v38 }
  0xed   :  { %549 = vmatpush.bf16.msrb.mxu0 %v1419_v44  ;;  %562 = vmatpush.bf16.msrb.mxu1 %v1423_v45 }
  0xee   :  { %575 = vmatpush.bf16.msrb.mxu2 %v1425_v46  ;;  %588 = vmatpush.bf16.msrb.mxu3 %v1428_v50 }
  0xf1   :  { %550 = vmatpush.bf16.msrb.mxu0 %v1431_v56  ;;  %563 = vmatpush.bf16.msrb.mxu1 %v1435_v57 }
  0xf2   :  { %576 = vmatpush.bf16.msrb.mxu2 %v1437_v58  ;;  %589 = vmatpush.bf16.msrb.mxu3 %v1440_v62 }
  0xf5   :  { %551 = vmatpush.bf16.msrb.mxu0 %v1443_v5  ;;  %564 = vmatpush.bf16.msrb.mxu1 %v1447_v6 }
  0xf6   :  { %577 = vmatpush.bf16.msrb.mxu2 %v1449_v9  ;;  %590 = vmatpush.bf16.msrb.mxu3 %v1452_v14 }
  0xf9   :  { %552 = vmatpush.bf16.msrb.mxu0 %v1455_v23  ;;  %565 = vmatpush.bf16.msrb.mxu1 %v1459_v24 }
  0xfa   :  { %578 = vmatpush.bf16.msrb.mxu2 %v1461_v26  ;;  %591 = vmatpush.bf16.msrb.mxu3 %v1464_v31 }
  0xfd   :  { %553 = vmatpush.bf16.msrb.mxu0 %v1467_v40  ;;  %566 = vmatpush.bf16.msrb.mxu1 %v1471_v41 }
  0xfe   :  { %579 = vmatpush.bf16.msrb.mxu2 %v1473_v42  ;;  %592 = vmatpush.bf16.msrb.mxu3 %v1476_v43 }
 0x15c   :  { %v379_v54 = vpop.f32.mrf.mxu0  ;;  %v392_v59 = vpop.f32.mrf.mxu1 }
 0x15d   :  { %v426_v63 = vrot.slane %v392_v59, 7 }
 0x15f   :  { %v429_v15 = vsel %vm338_vm0, %v379_v54, %v426_v63 }
 0x163   :  { %v405_v0 = vpop.f32.mrf.mxu2  ;;  %v418_v1 = vpop.f32.mrf.mxu3 }
 0x164   :  { %v427_v2 = vrot.slane %v405_v0, 6  ;;  %v428_v10 = vrot.slane %v418_v1, 5  ;;  %v381_v11 = vpop.f32.mrf.mxu0  ;;  %v394_v13 = vpop.f32.mrf.mxu1  ;;  %v454_v1 = vstv %s1137_s16 }
 0x166   :  { %v430_v18 = vsel %vm340_vm1, %v427_v2, %v428_v10  ;;  %v455_v2 = vmul.f32 %v454_v1, %v1546_v51 }
 0x167   :  { %v431_v19 = vsel %vm342_vm2, %v429_v15, %v430_v18 }
 0x168   :  { %v433_v20 = vadd.f32 %v431_v19, %v368_v4  ;;  %v456_v15 = vadd.f32 %v455_v2, %v1549_v55 }
 0x16a   :  { %1187 = vtanh.f32 %v433_v20 }
 0x16b   :  { %v407_v22 = vpop.f32.mrf.mxu2  ;;  %v420_v27 = vpop.f32.mrf.mxu3 }
 0x170   :  { %v1188_v28 = vpop.eup %1187 }
 0x171   :  { %v435_v30 = vmul.f32 0.5, %v1188_v28  ;;  %v438_v32 = vrot.slane %v1188_v28, 1  ;;  %v447_v47 = vrot.slane %v1188_v28, 2  ;;  %v442_v52 = vrot.slane %v1188_v28, 3 }
 0x173   :  { %v436_v35 = vadd.f32 0.5, %v435_v30  ;;  %v440_v36 = vmul.f32 0.5, %v438_v32  ;;  %v444_v54 = vmul.f32 0.5, %v442_v52 }
 0x175   :  { %v441_v37 = vadd.f32 0.5, %v440_v36  ;;  %v449_v49 = vmul.f32 %v447_v47, %v436_v35  ;;  %v445_v59 = vadd.f32 0.5, %v444_v54 }
 0x177   :  { %v446_v48 = vmul.f32 %v441_v37, %v1555_v39 }
 0x179   :  { %v1596_v53 = vadd.f32 %v449_v49, %v446_v48 }
 0x17b   :  { %1189 = vtanh.f32 %v1596_v53 }
 0x181   :  { %v1190_v60 = vpop.eup %1189 }
 0x182   :  { %v452_v61 = vmul.f32 %v1190_v60, %v445_v59 }
 0x184   :  { %v457_v63 = vpack.c.bf16 %v452_v61, %v452_v61 }
 0x186   :  { %466 = vmatmul.bf16.vlgmr.msra.gmra.mxu0 %v457_v63  ;;  %479 = vmatmul.bf16.vlgmr.msra.gmra.mxu1 %v457_v63 }
 0x187   :  { %492 = vmatmul.bf16.vlgmr.msra.gmra.mxu2 %v457_v63  ;;  %505 = vmatmul.bf16.vlgmr.msra.gmra.mxu3 %v457_v63 }
 0x188   :  { %634 = vmatpush.bf16.msra.mxu0 %v1386_v3  ;;  %647 = vmatpush.bf16.msra.mxu1 %v1388_v7 }
 0x189   :  { %660 = vmatpush.bf16.msra.mxu2 %v1390_v8  ;;  %673 = vmatpush.bf16.msra.mxu3 %v1393_v12 }
 0x18c   :  { %635 = vmatpush.bf16.msra.mxu0 %v1397_v16  ;;  %648 = vmatpush.bf16.msra.mxu1 %v1399_v17 }
 0x18d   :  { %661 = vmatpush.bf16.msra.mxu2 %v1402_v21  ;;  %674 = vmatpush.bf16.msra.mxu3 %v1404_v25 }
 0x190   :  { %636 = vmatpush.bf16.msra.mxu0 %v1407_v29  ;;  %649 = vmatpush.bf16.msra.mxu1 %v1411_v33 }
 0x191   :  { %662 = vmatpush.bf16.msra.mxu2 %v1413_v34  ;;  %675 = vmatpush.bf16.msra.mxu3 %v1416_v38 }
 0x194   :  { %637 = vmatpush.bf16.msra.mxu0 %v1419_v44  ;;  %650 = vmatpush.bf16.msra.mxu1 %v1423_v45 }
 0x195   :  { %663 = vmatpush.bf16.msra.mxu2 %v1425_v46  ;;  %676 = vmatpush.bf16.msra.mxu3 %v1428_v50 }
 0x198   :  { %638 = vmatpush.bf16.msra.mxu0 %v1431_v56  ;;  %651 = vmatpush.bf16.msra.mxu1 %v1435_v57 }
 0x199   :  { %664 = vmatpush.bf16.msra.mxu2 %v1437_v58  ;;  %677 = vmatpush.bf16.msra.mxu3 %v1440_v62 }
 0x19c   :  { %639 = vmatpush.bf16.msra.mxu0 %v1443_v5  ;;  %652 = vmatpush.bf16.msra.mxu1 %v1447_v6 }
 0x19d   :  { %665 = vmatpush.bf16.msra.mxu2 %v1449_v9  ;;  %678 = vmatpush.bf16.msra.mxu3 %v1452_v14 }
 0x1a0   :  { %640 = vmatpush.bf16.msra.mxu0 %v1455_v23  ;;  %653 = vmatpush.bf16.msra.mxu1 %v1459_v24 }
 0x1a1   :  { %666 = vmatpush.bf16.msra.mxu2 %v1461_v26  ;;  %679 = vmatpush.bf16.msra.mxu3 %v1464_v31 }
 0x1a4   :  { %641 = vmatpush.bf16.msra.mxu0 %v1467_v40  ;;  %654 = vmatpush.bf16.msra.mxu1 %v1471_v41 }
 0x1a5   :  { %667 = vmatpush.bf16.msra.mxu2 %v1473_v42  ;;  %680 = vmatpush.bf16.msra.mxu3 %v1476_v43 }
 0x203   :  { %v467_v39 = vpop.f32.mrf.mxu0  ;;  %v480_v0 = vpop.f32.mrf.mxu1 }
 0x204   :  { %v514_v4 = vrot.slane %v480_v0, 7 }
 0x206   :  { %v517_v22 = vsel %vm338_vm0, %v467_v39, %v514_v4 }
 0x20a   :  { %v493_v10 = vpop.f32.mrf.mxu2  ;;  %v506_v11 = vpop.f32.mrf.mxu3 }
 0x20b   :  { %v515_v13 = vrot.slane %v493_v10, 6  ;;  %v516_v18 = vrot.slane %v506_v11, 5  ;;  %v469_v19 = vpop.f32.mrf.mxu0  ;;  %v482_v20 = vpop.f32.mrf.mxu1  ;;  %v542_v11 = vstv %s1138_s17 }
 0x20d   :  { %v518_v27 = vsel %vm340_vm1, %v515_v13, %v516_v18  ;;  %v543_v13 = vmul.f32 %v542_v11, %v1546_v51 }
 0x20e   :  { %v519_v28 = vsel %vm342_vm2, %v517_v22, %v518_v27 }
 0x20f   :  { %v521_v30 = vadd.f32 %v519_v28, %v456_v15  ;;  %v544_v22 = vadd.f32 %v543_v13, %v1549_v55 }
 0x211   :  { %1191 = vtanh.f32 %v521_v30 }
 0x212   :  { %v495_v32 = vpop.f32.mrf.mxu2  ;;  %v508_v35 = vpop.f32.mrf.mxu3 }
 0x217   :  { %v1192_v36 = vpop.eup %1191 }
 0x218   :  { %v523_v37 = vmul.f32 0.5, %v1192_v36  ;;  %v526_v47 = vrot.slane %v1192_v36, 1  ;;  %v535_v54 = vrot.slane %v1192_v36, 2  ;;  %v530_v61 = vrot.slane %v1192_v36, 3 }
 0x21a   :  { %v524_v48 = vadd.f32 0.5, %v523_v37  ;;  %v528_v49 = vmul.f32 0.5, %v526_v47  ;;  %v532_v39 = vmul.f32 0.5, %v530_v61 }
 0x21c   :  { %v529_v52 = vadd.f32 0.5, %v528_v49  ;;  %v537_v60 = vmul.f32 %v535_v54, %v524_v48  ;;  %v533_v0 = vadd.f32 0.5, %v532_v39 }
 0x21e   :  { %v534_v59 = vmul.f32 %v529_v52, %v1596_v53 }
 0x220   :  { %v1637_v63 = vadd.f32 %v537_v60, %v534_v59 }
 0x222   :  { %1193 = vtanh.f32 %v1637_v63 }
 0x228   :  { %v1194_v1 = vpop.eup %1193 }
 0x229   :  { %v540_v2 = vmul.f32 %v1194_v1, %v533_v0 }
 0x22b   :  { %v545_v4 = vpack.c.bf16 %v540_v2, %v540_v2 }
 0x22d   :  { %554 = vmatmul.bf16.vlgmr.msrb.gmra.mxu0 %v545_v4  ;;  %567 = vmatmul.bf16.vlgmr.msrb.gmra.mxu1 %v545_v4 }
 0x22e   :  { %580 = vmatmul.bf16.vlgmr.msrb.gmra.mxu2 %v545_v4  ;;  %593 = vmatmul.bf16.vlgmr.msrb.gmra.mxu3 %v545_v4 }
 0x22f   :  { %722 = vmatpush.bf16.msrb.mxu0 %v1386_v3  ;;  %735 = vmatpush.bf16.msrb.mxu1 %v1388_v7 }
 0x230   :  { %748 = vmatpush.bf16.msrb.mxu2 %v1390_v8  ;;  %761 = vmatpush.bf16.msrb.mxu3 %v1393_v12 }
 0x233   :  { %723 = vmatpush.bf16.msrb.mxu0 %v1397_v16  ;;  %736 = vmatpush.bf16.msrb.mxu1 %v1399_v17 }
 0x234   :  { %749 = vmatpush.bf16.msrb.mxu2 %v1402_v21  ;;  %762 = vmatpush.bf16.msrb.mxu3 %v1404_v25 }
 0x237   :  { %724 = vmatpush.bf16.msrb.mxu0 %v1407_v29  ;;  %737 = vmatpush.bf16.msrb.mxu1 %v1411_v33 }
 0x238   :  { %750 = vmatpush.bf16.msrb.mxu2 %v1413_v34  ;;  %763 = vmatpush.bf16.msrb.mxu3 %v1416_v38 }
 0x23b   :  { %725 = vmatpush.bf16.msrb.mxu0 %v1419_v44  ;;  %738 = vmatpush.bf16.msrb.mxu1 %v1423_v45 }
 0x23c   :  { %751 = vmatpush.bf16.msrb.mxu2 %v1425_v46  ;;  %764 = vmatpush.bf16.msrb.mxu3 %v1428_v50 }
 0x23f   :  { %726 = vmatpush.bf16.msrb.mxu0 %v1431_v56  ;;  %739 = vmatpush.bf16.msrb.mxu1 %v1435_v57 }
 0x240   :  { %752 = vmatpush.bf16.msrb.mxu2 %v1437_v58  ;;  %765 = vmatpush.bf16.msrb.mxu3 %v1440_v62 }
 0x243   :  { %727 = vmatpush.bf16.msrb.mxu0 %v1443_v5  ;;  %740 = vmatpush.bf16.msrb.mxu1 %v1447_v6 }
 0x244   :  { %753 = vmatpush.bf16.msrb.mxu2 %v1449_v9  ;;  %766 = vmatpush.bf16.msrb.mxu3 %v1452_v14 }
 0x247   :  { %728 = vmatpush.bf16.msrb.mxu0 %v1455_v23  ;;  %741 = vmatpush.bf16.msrb.mxu1 %v1459_v24 }
 0x248   :  { %754 = vmatpush.bf16.msrb.mxu2 %v1461_v26  ;;  %767 = vmatpush.bf16.msrb.mxu3 %v1464_v31 }
 0x24b   :  { %729 = vmatpush.bf16.msrb.mxu0 %v1467_v40  ;;  %742 = vmatpush.bf16.msrb.mxu1 %v1471_v41 }
 0x24c   :  { %755 = vmatpush.bf16.msrb.mxu2 %v1473_v42  ;;  %768 = vmatpush.bf16.msrb.mxu3 %v1476_v43 }
 0x2aa   :  { %v555_v53 = vpop.f32.mrf.mxu0  ;;  %v568_v10 = vpop.f32.mrf.mxu1 }
 0x2ab   :  { %v602_v15 = vrot.slane %v568_v10, 7 }
 0x2ad   :  { %v605_v32 = vsel %vm338_vm0, %v555_v53, %v602_v15 }
 0x2b1   :  { %v581_v18 = vpop.f32.mrf.mxu2  ;;  %v594_v19 = vpop.f32.mrf.mxu3 }
 0x2b2   :  { %v603_v20 = vrot.slane %v581_v18, 6  ;;  %v604_v27 = vrot.slane %v594_v19, 5  ;;  %v557_v28 = vpop.f32.mrf.mxu0  ;;  %v570_v30 = vpop.f32.mrf.mxu1  ;;  %v630_v19 = vstv %s1139_s18 }
 0x2b4   :  { %v606_v35 = vsel %vm340_vm1, %v603_v20, %v604_v27  ;;  %v631_v20 = vmul.f32 %v630_v19, %v1546_v51 }
 0x2b5   :  { %v607_v36 = vsel %vm342_vm2, %v605_v32, %v606_v35 }
 0x2b6   :  { %v609_v37 = vadd.f32 %v607_v36, %v544_v22  ;;  %v632_v32 = vadd.f32 %v631_v20, %v1549_v55 }
 0x2b8   :  { %1195 = vtanh.f32 %v609_v37 }
 0x2b9   :  { %v583_v47 = vpop.f32.mrf.mxu2  ;;  %v596_v48 = vpop.f32.mrf.mxu3 }
 0x2be   :  { %v1196_v49 = vpop.eup %1195 }
 0x2bf   :  { %v611_v52 = vmul.f32 0.5, %v1196_v49  ;;  %v614_v54 = vrot.slane %v1196_v49, 1  ;;  %v623_v39 = vrot.slane %v1196_v49, 2  ;;  %v618_v2 = vrot.slane %v1196_v49, 3 }
 0x2c1   :  { %v612_v59 = vadd.f32 0.5, %v611_v52  ;;  %v616_v60 = vmul.f32 0.5, %v614_v54  ;;  %v620_v53 = vmul.f32 0.5, %v618_v2 }
 0x2c3   :  { %v617_v61 = vadd.f32 0.5, %v616_v60  ;;  %v625_v1 = vmul.f32 %v623_v39, %v612_v59  ;;  %v621_v10 = vadd.f32 0.5, %v620_v53 }
 0x2c5   :  { %v622_v0 = vmul.f32 %v617_v61, %v1637_v63 }
 0x2c7   :  { %v1678_v4 = vadd.f32 %v625_v1, %v622_v0 }
 0x2c9   :  { %1197 = vtanh.f32 %v1678_v4 }
 0x2cf   :  { %v1198_v11 = vpop.eup %1197 }
 0x2d0   :  { %v628_v13 = vmul.f32 %v1198_v11, %v621_v10 }
 0x2d2   :  { %v633_v15 = vpack.c.bf16 %v628_v13, %v628_v13 }
 0x2d4   :  { %642 = vmatmul.bf16.vlgmr.msra.gmra.mxu0 %v633_v15  ;;  %655 = vmatmul.bf16.vlgmr.msra.gmra.mxu1 %v633_v15 }
 0x2d5   :  { %668 = vmatmul.bf16.vlgmr.msra.gmra.mxu2 %v633_v15  ;;  %681 = vmatmul.bf16.vlgmr.msra.gmra.mxu3 %v633_v15 }
 0x2d6   :  { %810 = vmatpush.bf16.msra.mxu0 %v1386_v3  ;;  %823 = vmatpush.bf16.msra.mxu1 %v1388_v7 }
 0x2d7   :  { %836 = vmatpush.bf16.msra.mxu2 %v1390_v8  ;;  %849 = vmatpush.bf16.msra.mxu3 %v1393_v12 }
 0x2da   :  { %811 = vmatpush.bf16.msra.mxu0 %v1397_v16  ;;  %824 = vmatpush.bf16.msra.mxu1 %v1399_v17 }
 0x2db   :  { %837 = vmatpush.bf16.msra.mxu2 %v1402_v21  ;;  %850 = vmatpush.bf16.msra.mxu3 %v1404_v25 }
 0x2de   :  { %812 = vmatpush.bf16.msra.mxu0 %v1407_v29  ;;  %825 = vmatpush.bf16.msra.mxu1 %v1411_v33 }
 0x2df   :  { %838 = vmatpush.bf16.msra.mxu2 %v1413_v34  ;;  %851 = vmatpush.bf16.msra.mxu3 %v1416_v38 }
 0x2e2   :  { %813 = vmatpush.bf16.msra.mxu0 %v1419_v44  ;;  %826 = vmatpush.bf16.msra.mxu1 %v1423_v45 }
 0x2e3   :  { %839 = vmatpush.bf16.msra.mxu2 %v1425_v46  ;;  %852 = vmatpush.bf16.msra.mxu3 %v1428_v50 }
 0x2e6   :  { %814 = vmatpush.bf16.msra.mxu0 %v1431_v56  ;;  %827 = vmatpush.bf16.msra.mxu1 %v1435_v57 }
 0x2e7   :  { %840 = vmatpush.bf16.msra.mxu2 %v1437_v58  ;;  %853 = vmatpush.bf16.msra.mxu3 %v1440_v62 }
 0x2ea   :  { %815 = vmatpush.bf16.msra.mxu0 %v1443_v5  ;;  %828 = vmatpush.bf16.msra.mxu1 %v1447_v6 }
 0x2eb   :  { %841 = vmatpush.bf16.msra.mxu2 %v1449_v9  ;;  %854 = vmatpush.bf16.msra.mxu3 %v1452_v14 }
 0x2ee   :  { %816 = vmatpush.bf16.msra.mxu0 %v1455_v23  ;;  %829 = vmatpush.bf16.msra.mxu1 %v1459_v24 }
 0x2ef   :  { %842 = vmatpush.bf16.msra.mxu2 %v1461_v26  ;;  %855 = vmatpush.bf16.msra.mxu3 %v1464_v31 }
 0x2f2   :  { %817 = vmatpush.bf16.msra.mxu0 %v1467_v40  ;;  %830 = vmatpush.bf16.msra.mxu1 %v1471_v41 }
 0x2f3   :  { %843 = vmatpush.bf16.msra.mxu2 %v1473_v42  ;;  %856 = vmatpush.bf16.msra.mxu3 %v1476_v43 }
 0x351   :  { %v643_v63 = vpop.f32.mrf.mxu0  ;;  %v656_v18 = vpop.f32.mrf.mxu1 }
 0x352   :  { %v690_v22 = vrot.slane %v656_v18, 7 }
 0x354   :  { %v693_v47 = vsel %vm338_vm0, %v643_v63, %v690_v22 }
 0x358   :  { %v669_v27 = vpop.f32.mrf.mxu2  ;;  %v682_v28 = vpop.f32.mrf.mxu3 }
 0x359   :  { %v691_v30 = vrot.slane %v669_v27, 6  ;;  %v692_v35 = vrot.slane %v682_v28, 5  ;;  %v645_v36 = vpop.f32.mrf.mxu0  ;;  %v658_v37 = vpop.f32.mrf.mxu1 }
 0x35b   :  { %v694_v48 = vsel %vm340_vm1, %v691_v30, %v692_v35 }
 0x35c   :  { %v695_v49 = vsel %vm342_vm2, %v693_v47, %v694_v48 }
 0x35d   :  { %v697_v52 = vadd.f32 %v695_v49, %v632_v32  ;;  %v806_v32 = vstv %s1141_s20 }
 0x35e   :  { %v807_v35 = vmul.f32 %v806_v32, %v1546_v51  ;;  %v981_v32 = vld [vmem:[%s1784_s4] sm:$0x1] }
 0x35f   :  { %1199 = vtanh.f32 %v697_v52 }
 0x360   :  { %v671_v54 = vpop.f32.mrf.mxu2  ;;  %v684_v59 = vpop.f32.mrf.mxu3  ;;  %v808_v49 = vadd.f32 %v807_v35, %v1549_v55 }
 0x365   :  { %v1200_v60 = vpop.eup %1199 }
 0x366   :  { %v699_v61 = vmul.f32 0.5, %v1200_v60  ;;  %v702_v39 = vrot.slane %v1200_v60, 1  ;;  %v711_v53 = vrot.slane %v1200_v60, 2  ;;  %v706_v13 = vrot.slane %v1200_v60, 3 }
 0x368   :  { %v700_v0 = vadd.f32 0.5, %v699_v61  ;;  %v704_v1 = vmul.f32 0.5, %v702_v39  ;;  %v708_v63 = vmul.f32 0.5, %v706_v13 }
 0x36a   :  { %v705_v2 = vadd.f32 0.5, %v704_v1  ;;  %v713_v11 = vmul.f32 %v711_v53, %v700_v0  ;;  %v709_v18 = vadd.f32 0.5, %v708_v63 }
 0x36c   :  { %v710_v10 = vmul.f32 %v705_v2, %v1678_v4 }
 0x36e   :  { %v1719_v15 = vadd.f32 %v713_v11, %v710_v10 }
 0x370   :  { %1201 = vtanh.f32 %v1719_v15 }
 0x376   :  { %v1202_v19 = vpop.eup %1201 }
 0x377   :  { %v716_v20 = vmul.f32 %v1202_v19, %v709_v18 }
 0x379   :  { %v721_v22 = vpack.c.bf16 %v716_v20, %v716_v20 }
 0x37b   :  { %730 = vmatmul.bf16.vlgmr.msrb.gmra.mxu0 %v721_v22  ;;  %743 = vmatmul.bf16.vlgmr.msrb.gmra.mxu1 %v721_v22 }
 0x37c   :  { %756 = vmatmul.bf16.vlgmr.msrb.gmra.mxu2 %v721_v22  ;;  %769 = vmatmul.bf16.vlgmr.msrb.gmra.mxu3 %v721_v22 }
 0x37d   :  { %898 = vmatpush.bf16.msrb.mxu0 %v1386_v3  ;;  %911 = vmatpush.bf16.msrb.mxu1 %v1388_v7 }
 0x37e   :  { %924 = vmatpush.bf16.msrb.mxu2 %v1390_v8  ;;  %937 = vmatpush.bf16.msrb.mxu3 %v1393_v12  ;;  %v718_v8 = vstv %s1140_s19 }
 0x37f   :  { %v719_v12 = vmul.f32 %v718_v8, %v1546_v51 }
 0x381   :  { %899 = vmatpush.bf16.msrb.mxu0 %v1397_v16  ;;  %912 = vmatpush.bf16.msrb.mxu1 %v1399_v17 }
 0x382   :  { %925 = vmatpush.bf16.msrb.mxu2 %v1402_v21  ;;  %938 = vmatpush.bf16.msrb.mxu3 %v1404_v25 }
 0x385   :  { %900 = vmatpush.bf16.msrb.mxu0 %v1407_v29  ;;  %913 = vmatpush.bf16.msrb.mxu1 %v1411_v33  ;;  %v720_v29 = vadd.f32 %v719_v12, %v1549_v55 }
 0x386   :  { %926 = vmatpush.bf16.msrb.mxu2 %v1413_v34  ;;  %939 = vmatpush.bf16.msrb.mxu3 %v1416_v38 }
 0x389   :  { %901 = vmatpush.bf16.msrb.mxu0 %v1419_v44  ;;  %914 = vmatpush.bf16.msrb.mxu1 %v1423_v45 }
 0x38a   :  { %927 = vmatpush.bf16.msrb.mxu2 %v1425_v46  ;;  %940 = vmatpush.bf16.msrb.mxu3 %v1428_v50 }
 0x38d   :  { %902 = vmatpush.bf16.msrb.mxu0 %v1431_v56  ;;  %915 = vmatpush.bf16.msrb.mxu1 %v1435_v57 }
 0x38e   :  { %928 = vmatpush.bf16.msrb.mxu2 %v1437_v58  ;;  %941 = vmatpush.bf16.msrb.mxu3 %v1440_v62 }
 0x391   :  { %903 = vmatpush.bf16.msrb.mxu0 %v1443_v5  ;;  %916 = vmatpush.bf16.msrb.mxu1 %v1447_v6 }
 0x392   :  { %929 = vmatpush.bf16.msrb.mxu2 %v1449_v9  ;;  %942 = vmatpush.bf16.msrb.mxu3 %v1452_v14 }
 0x395   :  { %904 = vmatpush.bf16.msrb.mxu0 %v1455_v23  ;;  %917 = vmatpush.bf16.msrb.mxu1 %v1459_v24 }
 0x396   :  { %930 = vmatpush.bf16.msrb.mxu2 %v1461_v26  ;;  %943 = vmatpush.bf16.msrb.mxu3 %v1464_v31 }
 0x399   :  { %905 = vmatpush.bf16.msrb.mxu0 %v1467_v40  ;;  %918 = vmatpush.bf16.msrb.mxu1 %v1471_v41 }
 0x39a   :  { %931 = vmatpush.bf16.msrb.mxu2 %v1473_v42  ;;  %944 = vmatpush.bf16.msrb.mxu3 %v1476_v43 }
 0x3f8   :  { %v731_v3 = vpop.f32.mrf.mxu0  ;;  %v744_v7 = vpop.f32.mrf.mxu1 }
 0x3f9   :  { %v778_v16 = vrot.slane %v744_v7, 7 }
 0x3fb   :  { %v781_v44 = vsel %vm338_vm0, %v731_v3, %v778_v16 }
 0x3ff   :  { %v757_v17 = vpop.f32.mrf.mxu2  ;;  %v770_v21 = vpop.f32.mrf.mxu3 }
 0x400   :  { %v779_v25 = vrot.slane %v757_v17, 6  ;;  %v780_v33 = vrot.slane %v770_v21, 5  ;;  %v733_v34 = vpop.f32.mrf.mxu0  ;;  %v746_v38 = vpop.f32.mrf.mxu1 }
 0x402   :  { %v782_v45 = vsel %vm340_vm1, %v779_v25, %v780_v33 }
 0x403   :  { %v783_v46 = vsel %vm342_vm2, %v781_v44, %v782_v45 }
 0x404   :  { %v785_v50 = vadd.f32 %v783_v46, %v720_v29  ;;  %v894_v29 = vstv %s1142_s21 }
 0x405   :  { %v895_v33 = vmul.f32 %v894_v29, %v1546_v51 }
 0x406   :  { %1203 = vtanh.f32 %v785_v50 }
 0x407   :  { %v759_v56 = vpop.f32.mrf.mxu2  ;;  %v772_v57 = vpop.f32.mrf.mxu3  ;;  %v896_v46 = vadd.f32 %v895_v33, %v1549_v55 }
 0x40c   :  { %v1204_v58 = vpop.eup %1203 }
 0x40d   :  { %v787_v62 = vmul.f32 0.5, %v1204_v58  ;;  %v790_v5 = vrot.slane %v1204_v58, 1  ;;  %v799_v23 = vrot.slane %v1204_v58, 2  ;;  %v794_v31 = vrot.slane %v1204_v58, 3 }
 0x40f   :  { %v788_v6 = vadd.f32 0.5, %v787_v62  ;;  %v792_v9 = vmul.f32 0.5, %v790_v5  ;;  %v796_v41 = vmul.f32 0.5, %v794_v31 }
 0x411   :  { %v793_v14 = vadd.f32 0.5, %v792_v9  ;;  %v801_v26 = vmul.f32 %v799_v23, %v788_v6  ;;  %v797_v42 = vadd.f32 0.5, %v796_v41 }
 0x413   :  { %v798_v24 = vmul.f32 %v793_v14, %v1719_v15 }
 0x415   :  { %v802_v40 = vadd.f32 %v801_v26, %v798_v24 }
 0x417   :  { %1205 = vtanh.f32 %v802_v40 }
 0x41d   :  { %v1206_v43 = vpop.eup %1205 }
 0x41e   :  { %v804_v4 = vmul.f32 %v1206_v43, %v797_v42 }
 0x420   :  { %v809_v27 = vpack.c.bf16 %v804_v4, %v804_v4 }
 0x422   :  { %818 = vmatmul.bf16.vlgmr.msra.gmra.mxu0 %v809_v27  ;;  %831 = vmatmul.bf16.vlgmr.msra.gmra.mxu1 %v809_v27 }
 0x423   :  { %844 = vmatmul.bf16.vlgmr.msra.gmra.mxu2 %v809_v27  ;;  %857 = vmatmul.bf16.vlgmr.msra.gmra.mxu3 %v809_v27 }
 0x49f   :  { %v819_v28 = vpop.f32.mrf.mxu0  ;;  %v832_v30 = vpop.f32.mrf.mxu1 }
 0x4a0   :  { %v866_v36 = vrot.slane %v832_v30, 7 }
 0x4a2   :  { %v869_v60 = vsel %vm338_vm0, %v819_v28, %v866_v36 }
 0x4a6   :  { %v845_v37 = vpop.f32.mrf.mxu2  ;;  %v858_v47 = vpop.f32.mrf.mxu3 }
 0x4a7   :  { %v867_v48 = vrot.slane %v845_v37, 6  ;;  %v868_v52 = vrot.slane %v858_v47, 5  ;;  %v821_v54 = vpop.f32.mrf.mxu0  ;;  %v834_v59 = vpop.f32.mrf.mxu1  ;;  %v986_v47 = vld [vmem:[%s1785_s5] sm:$0x1] }
 0x4a9   :  { %v870_v61 = vsel %vm340_vm1, %v867_v48, %v868_v52 }
 0x4aa   :  { %v871_v39 = vsel %vm342_vm2, %v869_v60, %v870_v61 }
 0x4ab   :  { %v873_v0 = vadd.f32 %v871_v39, %v808_v49 }
 0x4ad   :  { %1207 = vtanh.f32 %v873_v0 }
 0x4ae   :  { %v847_v1 = vpop.f32.mrf.mxu2  ;;  %v860_v2 = vpop.f32.mrf.mxu3 }
 0x4b3   :  { %v1208_v53 = vpop.eup %1207 }
 0x4b4   :  { %v875_v10 = vmul.f32 0.5, %v1208_v53  ;;  %v878_v11 = vrot.slane %v1208_v53, 1  ;;  %v887_v18 = vrot.slane %v1208_v53, 2  ;;  %v882_v22 = vrot.slane %v1208_v53, 3 }
 0x4b6   :  { %v876_v13 = vadd.f32 0.5, %v875_v10  ;;  %v880_v15 = vmul.f32 0.5, %v878_v11  ;;  %v884_v7 = vmul.f32 0.5, %v882_v22 }
 0x4b8   :  { %v881_v63 = vadd.f32 0.5, %v880_v15  ;;  %v889_v20 = vmul.f32 %v887_v18, %v876_v13  ;;  %v885_v8 = vadd.f32 0.5, %v884_v7 }
 0x4ba   :  { %v886_v19 = vmul.f32 %v881_v63, %v802_v40 }
 0x4bc   :  { %v890_v3 = vadd.f32 %v889_v20, %v886_v19 }
 0x4be   :  { %1209 = vtanh.f32 %v890_v3 }
 0x4c4   :  { %v1210_v12 = vpop.eup %1209 }
 0x4c5   :  { %v892_v16 = vmul.f32 %v1210_v12, %v885_v8 }
 0x4c7   :  { %v897_v17 = vpack.c.bf16 %v892_v16, %v892_v16 }
 0x4c9   :  { %906 = vmatmul.bf16.vlgmr.msrb.gmra.mxu0 %v897_v17  ;;  %919 = vmatmul.bf16.vlgmr.msrb.gmra.mxu1 %v897_v17 }
 0x4ca   :  { %932 = vmatmul.bf16.vlgmr.msrb.gmra.mxu2 %v897_v17  ;;  %945 = vmatmul.bf16.vlgmr.msrb.gmra.mxu3 %v897_v17 }
 0x546   :  { %v907_v21 = vpop.f32.mrf.mxu0  ;;  %v920_v25 = vpop.f32.mrf.mxu1 }
 0x547   :  { %v954_v34 = vrot.slane %v920_v25, 7 }
 0x549   :  { %v957_v58 = vsel %vm338_vm0, %v907_v21, %v954_v34 }
 0x54d   :  { %v933_v38 = vpop.f32.mrf.mxu2  ;;  %v946_v44 = vpop.f32.mrf.mxu3 }
 0x54e   :  { %v955_v45 = vrot.slane %v933_v38, 6  ;;  %v956_v50 = vrot.slane %v946_v44, 5  ;;  %v909_v56 = vpop.f32.mrf.mxu0  ;;  %v922_v57 = vpop.f32.mrf.mxu1 }
 0x550   :  { %v958_v62 = vsel %vm340_vm1, %v955_v45, %v956_v50 }
 0x551   :  { %v959_v5 = vsel %vm342_vm2, %v957_v58, %v958_v62 }
 0x552   :  { %v961_v6 = vadd.f32 %v959_v5, %v896_v46 }
 0x554   :  { %1211 = vtanh.f32 %v961_v6 }
 0x555   :  { %v935_v9 = vpop.f32.mrf.mxu2  ;;  %v948_v14 = vpop.f32.mrf.mxu3 }
 0x55a   :  { %v1212_v51 = vpop.eup %1211 }
 0x55b   :  { %v963_v23 = vmul.f32 0.5, %v1212_v51  ;;  %v966_v24 = vrot.slane %v1212_v51, 1  ;;  %v975_v55 = vrot.slane %v1212_v51, 2  ;;  %v970_v43 = vrot.slane %v1212_v51, 3 }
 0x55d   :  { %v964_v26 = vadd.f32 0.5, %v963_v23  ;;  %v968_v31 = vmul.f32 0.5, %v966_v24  ;;  %v972_v27 = vmul.f32 0.5, %v970_v43 }
 0x55f   :  { %v969_v40 = vadd.f32 0.5, %v968_v31  ;;  %v977_v42 = vmul.f32 %v975_v55, %v964_v26  ;;  %v973_v28 = vadd.f32 0.5, %v972_v27 }
 0x561   :  { %v974_v41 = vmul.f32 %v969_v40, %v890_v3 }
 0x563   :  { %v978_v4 = vadd.f32 %v977_v42, %v974_v41 }
 0x565   :  { %1213 = vtanh.f32 %v978_v4 }
 0x56b   :  { %v1214_v30 = vpop.eup %1213 }
 0x56c   :  { %v980_v35 = vmul.f32 %v1214_v30, %v973_v28 }
 0x56e   :  { %v982_v36 = vmul.f32 %v981_v32, %v980_v35 }
 0x570   :  { %v983_v37 = vsel %vm338_vm0, %v982_v36, 0.0 }
 0x571   :  { %984 = vadd.xlane.f32.xlu0 %v983_v37 }
 0x5e4   :  { %v985_v48 = vpop.xlane.xlu0 %984 }
 0x5e5   :  { %v987_v49 = vadd.f32 %v986_v47, %v985_v48 }
 0x5e7   :  { %988 = vst [vmem:[#allocation10] sm:$0x1] %v987_v49 }
 0x5e8   :  { %999 = dma.vmem_to_hbm [thread:$0]  %s995_s27, 16, %s997_s30, [#allocation4]  }
 0x5e9   :  { %1329 = dma.done.wait [#allocation4], 16  }
 0x5ea   :  { %1330 = vsyncadd [#allocation4], 4294967280 }
 0x5eb   :  { %1004 = vsyncpa [#allocation3], 1 }
 0x5ec   :  { %1005 = vsyncpa [#allocation8], 1 }
 0x5ed   :  { %1006 = vsyncpa [#allocation4], 1 }
 0x5ee   :  { %1007 = vsyncpa [#allocation5], 1 }

</bundles_post_ra>
